<compile_context>
chip_gen: v5e
topology: v5e:2x2
jax: 0.10.0
libtpu: 0.0.40
codegen_flags: <defaults>
</compile_context>

<pallas_src>
import functools

import jax
import jax.numpy as jnp
from jax.experimental import pallas as pl
from jax.experimental.pallas import tpu as pltpu


def _round_up(x, m):
    return ((x + m - 1) // m) * m


def _pick_batch_tile(n, cap=8):
    """Largest divisor of n not exceeding cap (images per grid step)."""
    bt = 1
    for c in range(1, min(n, cap) + 1):
        if n % c == 0:
            bt = c
    return bt


# ----------------------------------------------------------------------------
# Fused kernel: 1x1 mix (MXU, bf16) + zero-pad into VMEM scratch + depthwise
# KHxKW conv + bias (VPU, lane-dense), B_T images per grid step.
# ----------------------------------------------------------------------------
def _fused_kernel(x_ref, bmix_ref, taps_ref, bias_ref, o_ref, p_ref, *,
                  B_T, CH, H, W, Nc, KH, KW, ph, pw, WT, ROW0):
    OUT_L = W * Nc            # packed output lane width (lane-dense, 256 here)
    LT = WT * Nc              # padded packed lane width of the scratch
    IN_L = x_ref.shape[-1]

    # --- stage 1: pointwise mix on the MXU, one matmul for all B_T images. ---
    xb = x_ref[...].reshape(B_T * H, IN_L)                       # bf16, free merge
    y = jnp.dot(xb, bmix_ref[...],
                preferred_element_type=jnp.float32)              # (B_T*H, OUT_L)

    # --- stage 2: write into the per-image zero-padded VMEM scratch. ---------
    # Only the regions that are read back are touched (no full-scratch zeroing):
    #   data rows [ROW0, ROW0+H)            lanes [0, OUT_L)   <- y
    #   lane pad strip (same rows)          lanes [OUT_L, LT)  <- 0 (roll wrap)
    #   row pad strips [ROW0-ph, ROW0) and [ROW0+H, ROW0+H+ph) <- 0
    p_ref[:, ROW0:ROW0 + H, 0:OUT_L] = y.reshape(B_T, H, OUT_L)
    p_ref[:, ROW0:ROW0 + H, OUT_L:LT] = jnp.zeros(
        (B_T, H, LT - OUT_L), jnp.float32)
    p_ref[:, ROW0 - ph:ROW0, :] = jnp.zeros((B_T, ph, LT), jnp.float32)
    p_ref[:, ROW0 + H:ROW0 + H + ph, :] = jnp.zeros((B_T, ph, LT), jnp.float32)

    # --- stage 3: depthwise KHxKW conv + bias, lane-dense, CH images/chunk. --
    # Taps / bias are loaded once (hoisted) and reused across all chunks/taps.
    tap_rows = [taps_ref[j:j + 1, :] for j in range(KH * KW)]    # (1, OUT_L) each
    bias_row = bias_ref[...]                                     # (1, OUT_L)

    def chunk(i, carry):
        b0 = i * CH
        acc = jnp.zeros((CH * H, OUT_L), jnp.float32)
        for kh in range(KH):
            r0 = ROW0 - ph + kh
            # NOTE: for kh != ph this is a sublane-misaligned slice; Mosaic
            # realigns it (acceptable here vs. tripling the y store traffic).
            rows = p_ref[pl.ds(b0, CH), r0:r0 + H, :].reshape(CH * H, LT)
            for kw in range(KW):
                shift = ((pw - kw) * Nc) % LT
                t = pltpu.roll(rows, shift, 1) if shift else rows
                # accumulate at OUT_L width only (pad lanes never enter the FMA)
                acc = acc + t[:, :OUT_L] * tap_rows[kh * KW + kw]
        o_ref[pl.ds(b0, CH), :, :] = (
            (acc + bias_row).reshape(CH, H, OUT_L).astype(o_ref.dtype))
        return carry

    jax.lax.fori_loop(0, B_T // CH, chunk, 0)


# ----------------------------------------------------------------------------
# GSeparableConvNd.forward (2d conv mode)
# ----------------------------------------------------------------------------
def gseparable_conv2d_forward(x, in_H, out_H, weight_H, weight, bias,
                              padding=(1, 1), batch_tile=None):
    del in_H  # group elements are consumed by the (surrogate) GroupKernel
    N, C_in, num_in_H, H, W = x.shape
    C_out, num_out_H = weight_H.shape[0], weight_H.shape[1]
    KH, KW = weight.shape[-2], weight.shape[-1]
    ph, pw = padding
    # fused kernel assumes stride=1, dilation=1, 'same'-size zero padding
    assert 2 * ph == KH - 1 and 2 * pw == KW - 1, (padding, KH, KW)
    assert ph <= 8 and pw <= 8, (ph, pw)

    K = C_in * num_in_H
    Nc = C_out * num_out_H
    IN_L = W * K
    OUT_L = W * Nc

    # images per grid step (amortizes step overhead / MXU weight push); keep the
    # grid length >= 2 when possible so v7x's two cores both pipeline.
    B_T = _pick_batch_tile(N) if batch_tile is None else batch_tile
    assert N % B_T == 0, (N, B_T)
    CH = 2 if (B_T % 2 == 0) else 1        # depthwise chunk (bounds live vregs)

    # lane-packed channels-last input (bf16 -> single-pass MXU, half the DMA)
    x_packed = jnp.transpose(x.reshape(N, K, H, W), (0, 2, 3, 1)).reshape(
        N, H, IN_L).astype(jnp.bfloat16)

    # block-diagonal 1x1-mix weight so the mix lands directly in packed layout
    w_mat = weight_H.reshape(Nc, K).T.astype(jnp.float32)        # (K, Nc)
    bmix = jnp.kron(jnp.eye(W, dtype=jnp.float32), w_mat).astype(jnp.bfloat16)

    # depthwise taps tiled across the packed output lane axis (grid-invariant)
    taps = jnp.tile(weight.reshape(Nc, KH * KW).T.astype(jnp.float32),
                    (1, W))                                       # (KH*KW, OUT_L)

    if bias is not None:
        bvec = jnp.repeat(bias.reshape(C_out).astype(jnp.float32), num_out_H)
    else:
        bvec = jnp.zeros((Nc,), jnp.float32)
    bias_row = jnp.tile(bvec.reshape(1, Nc), (1, W))              # (1, OUT_L)

    ROW0 = 8                                  # aligned start of the data rows
    WT = _round_up(W + pw, 8)                 # lane pad so width rolls wrap into zeros
    LT = WT * Nc
    HP = _round_up(ROW0 + H + ph, 8)          # padded scratch rows per image

    kern = functools.partial(_fused_kernel, B_T=B_T, CH=CH, H=H, W=W, Nc=Nc,
                             KH=KH, KW=KW, ph=ph, pw=pw, WT=WT, ROW0=ROW0)
    out_packed = pl.pallas_call(
        kern,
        out_shape=jax.ShapeDtypeStruct((N, H, OUT_L), jnp.float32),
        grid_spec=pltpu.PrefetchScalarGridSpec(
            num_scalar_prefetch=0,
            grid=(N // B_T,),
            in_specs=[
                pl.BlockSpec((B_T, H, IN_L), lambda n: (n, 0, 0)),   # x (B_T imgs)
                pl.BlockSpec((IN_L, OUT_L), lambda n: (0, 0)),       # mix matrix
                pl.BlockSpec((KH * KW, OUT_L), lambda n: (0, 0)),    # tiled taps
                pl.BlockSpec((1, OUT_L), lambda n: (0, 0)),          # tiled bias
            ],
            out_specs=pl.BlockSpec((B_T, H, OUT_L), lambda n: (n, 0, 0)),
            scratch_shapes=[pltpu.VMEM((B_T, HP, LT), jnp.float32)],
        ),
        compiler_params=pltpu.CompilerParams(
            dimension_semantics=("parallel",)),
    )(x_packed, bmix, taps, bias_row)

    # back to PyTorch layout (N, C_out, num_out_H, H, W)
    out = out_packed.reshape(N, H, W, Nc)
    out = jnp.transpose(out, (0, 3, 1, 2)).reshape(N, C_out, num_out_H, H, W)
    return out, out_H


# ----------------------------------------------------------------------------
# Pure-JAX reference (mirrors the PyTorch forward, HIGHEST precision)
# ----------------------------------------------------------------------------
def reference_forward(x, out_H, weight_H, weight, bias, padding=(1, 1)):
    N, C_in, num_in_H, H, W = x.shape
    C_out, num_out_H = weight_H.shape[0], weight_H.shape[1]
    KH, KW = weight.shape[-2], weight.shape[-1]
    ph, pw = padding
    K = C_in * num_in_H
    Nc = C_out * num_out_H

    xi = x.reshape(N, K, H, W)
    wH = weight_H.reshape(Nc, K, 1, 1)
    y = jax.lax.conv_general_dilated(
        xi, wH, (1, 1), [(0, 0), (0, 0)],
        dimension_numbers=("NCHW", "OIHW", "NCHW"),
        precision=jax.lax.Precision.HIGHEST)
    wD = weight.reshape(Nc, 1, KH, KW)
    z = jax.lax.conv_general_dilated(
        y, wD, (1, 1), [(ph, ph), (pw, pw)],
        dimension_numbers=("NCHW", "OIHW", "NCHW"),
        feature_group_count=Nc,
        precision=jax.lax.Precision.HIGHEST)
    z = z.reshape(N, C_out, num_out_H, z.shape[-2], z.shape[-1])
    if bias is not None:
        z = z + bias  # (C_out,1,1,1) broadcast
    return z, out_H


# ----------------------------------------------------------------------------
if __name__ == "__main__":
    # module config (small, but large enough to exercise batching + grid steps)
    N, C_in, C_out = 8, 4, 4
    num_in_H, num_out_H = 4, 4
    H = W = 16
    KH = KW = 3
    padding = (1, 1)
    batch_tile = 4          # -> grid=(2,), 2 depthwise chunks of 2 images each

    key = jax.random.PRNGKey(0)
    k1, k2, k3, k4 = jax.random.split(key, 4)

    # deterministic "GroupKernel" outputs / parameters
    weight_H = 0.1 * jax.random.normal(
        k1, (C_out, num_out_H, C_in, num_in_H, 1, 1), jnp.float32)
    weight = 0.1 * jax.random.normal(
        k2, (C_out, num_out_H, KH, KW), jnp.float32)
    bias = 0.05 * jax.random.normal(k3, (C_out, 1, 1, 1), jnp.float32)

    x = jax.random.normal(k4, (N, C_in, num_in_H, H, W), jnp.float32)
    in_H = jnp.linspace(0.0, 2.0 * jnp.pi, num_in_H, endpoint=False)
    out_H = jnp.linspace(0.0, 2.0 * jnp.pi, num_out_H, endpoint=False)

    fwd = jax.jit(functools.partial(gseparable_conv2d_forward,
                                    padding=padding, batch_tile=batch_tile))
    out, out_H_ret = fwd(x, in_H, out_H, weight_H, weight, bias)
    out = jax.block_until_ready(out)

    ref, _ = reference_forward(x, out_H, weight_H, weight, bias, padding)
    ref = jax.block_until_ready(ref)

    assert out.shape == (N, C_out, num_out_H, H, W), out.shape
    assert out_H_ret.shape == out_H.shape
    # stage 1 runs in bf16 on the MXU (f32 accumulate) vs a HIGHEST-precision
    # reference; 2e-3 leaves margin for that single rounding step.
    assert jnp.allclose(out, ref, rtol=2e-3, atol=2e-3), (
        float(jnp.max(jnp.abs(out - ref))))

    print("KERNEL_OK")
</pallas_src>

<mosaic_0001>
module attributes {stable_mosaic.version = 11 : i64} {
  func.func @_fused_kernel(%arg0: i32, %arg1: memref<4x16x256xbf16, #tpu.memory_space<vmem>>, %arg2: memref<256x256xbf16, #tpu.memory_space<vmem>>, %arg3: memref<9x256xf32, #tpu.memory_space<vmem>>, %arg4: memref<1x256xf32, #tpu.memory_space<vmem>>, %arg5: memref<4x16x256xf32, #tpu.memory_space<vmem>>, %arg6: memref<4x32x384xf32, #tpu.memory_space<vmem>>) attributes {dimension_semantics = [#tpu.dimension_semantics<parallel>], iteration_bounds = array<i64: 2>, scalar_prefetch = 0 : i64, scratch_operands = 1 : i64, tpu.core_type = #tpu.core_type<tc>, window_params = [{transform_indices = @transform_0, window_bounds = array<i64: 4, 16, 256>}, {pipeline_mode = #tpu.pipeline_mode<synchronous>, transform_indices = @transform_1, window_bounds = array<i64: 256, 256>}, {pipeline_mode = #tpu.pipeline_mode<synchronous>, transform_indices = @transform_2, window_bounds = array<i64: 9, 256>}, {pipeline_mode = #tpu.pipeline_mode<synchronous>, transform_indices = @transform_3, window_bounds = array<i64: 1, 256>}, {transform_indices = @transform_4, window_bounds = array<i64: 4, 16, 256>}]} {
    %c0 = arith.constant 0 : index
    %c0_0 = arith.constant 0 : index
    %c0_1 = arith.constant 0 : index
    %0 = vector.load %arg1[%c0, %c0_0, %c0_1] : memref<4x16x256xbf16, #tpu.memory_space<vmem>>, vector<4x16x256xbf16>
    %1 = vector.shape_cast %0 : vector<4x16x256xbf16> to vector<64x256xbf16>
    %c0_2 = arith.constant 0 : index
    %c0_3 = arith.constant 0 : index
    %2 = vector.load %arg2[%c0_2, %c0_3] : memref<256x256xbf16, #tpu.memory_space<vmem>>, vector<256x256xbf16>
    %cst = arith.constant dense<0.000000e+00> : vector<64x256xf32>
    %3 = tpu.matmul %1, %2, %cst {dimension_numbers = #tpu.dot_dimension_numbers<[1], [0], [0], [1], [0, 0, 1, 1], [], []>} : vector<64x256xbf16>, vector<256x256xbf16>, vector<64x256xf32> -> vector<64x256xf32>
    %4 = vector.shape_cast %3 : vector<64x256xf32> to vector<4x16x256xf32>
    %c0_4 = arith.constant 0 : index
    %c8 = arith.constant 8 : index
    %c0_5 = arith.constant 0 : index
    %5 = vector.load %arg6[%c0_4, %c8, %c0_5] : memref<4x32x384xf32, #tpu.memory_space<vmem>>, vector<4x16x256xf32>
    tpu.vector_store %arg6[%c0_4, %c8, %c0_5], %4 {strides = array<i32>} : memref<4x32x384xf32, #tpu.memory_space<vmem>>, vector<4x16x256xf32>,
    %cst_6 = arith.constant 0.000000e+00 : f32
    %6 = vector.broadcast %cst_6 : f32 to vector<4x16x128xf32>
    %c0_7 = arith.constant 0 : index
    %c8_8 = arith.constant 8 : index
    %c256 = arith.constant 256 : index
    %7 = vector.load %arg6[%c0_7, %c8_8, %c256] : memref<4x32x384xf32, #tpu.memory_space<vmem>>, vector<4x16x128xf32>
    tpu.vector_store %arg6[%c0_7, %c8_8, %c256], %6 {strides = array<i32>} : memref<4x32x384xf32, #tpu.memory_space<vmem>>, vector<4x16x128xf32>,
    %cst_9 = arith.constant 0.000000e+00 : f32
    %8 = vector.broadcast %cst_9 : f32 to vector<4x1x384xf32>
    %c0_10 = arith.constant 0 : index
    %c7 = arith.constant 7 : index
    %c0_11 = arith.constant 0 : index
    %9 = vector.load %arg6[%c0_10, %c7, %c0_11] : memref<4x32x384xf32, #tpu.memory_space<vmem>>, vector<4x1x384xf32>
    tpu.vector_store %arg6[%c0_10, %c7, %c0_11], %8 {strides = array<i32>} : memref<4x32x384xf32, #tpu.memory_space<vmem>>, vector<4x1x384xf32>,
    %cst_12 = arith.constant 0.000000e+00 : f32
    %10 = vector.broadcast %cst_12 : f32 to vector<4x1x384xf32>
    %c0_13 = arith.constant 0 : index
    %c24 = arith.constant 24 : index
    %c0_14 = arith.constant 0 : index
    %11 = vector.load %arg6[%c0_13, %c24, %c0_14] : memref<4x32x384xf32, #tpu.memory_space<vmem>>, vector<4x1x384xf32>
    tpu.vector_store %arg6[%c0_13, %c24, %c0_14], %10 {strides = array<i32>} : memref<4x32x384xf32, #tpu.memory_space<vmem>>, vector<4x1x384xf32>,
    %c0_15 = arith.constant 0 : index
    %c0_16 = arith.constant 0 : index
    %12 = vector.load %arg3[%c0_15, %c0_16] : memref<9x256xf32, #tpu.memory_space<vmem>>, vector<1x256xf32>
    %c1 = arith.constant 1 : index
    %c0_17 = arith.constant 0 : index
    %13 = vector.load %arg3[%c1, %c0_17] : memref<9x256xf32, #tpu.memory_space<vmem>>, vector<1x256xf32>
    %c2 = arith.constant 2 : index
    %c0_18 = arith.constant 0 : index
    %14 = vector.load %arg3[%c2, %c0_18] : memref<9x256xf32, #tpu.memory_space<vmem>>, vector<1x256xf32>
    %c3 = arith.constant 3 : index
    %c0_19 = arith.constant 0 : index
    %15 = vector.load %arg3[%c3, %c0_19] : memref<9x256xf32, #tpu.memory_space<vmem>>, vector<1x256xf32>
    %c4 = arith.constant 4 : index
    %c0_20 = arith.constant 0 : index
    %16 = vector.load %arg3[%c4, %c0_20] : memref<9x256xf32, #tpu.memory_space<vmem>>, vector<1x256xf32>
    %c5 = arith.constant 5 : index
    %c0_21 = arith.constant 0 : index
    %17 = vector.load %arg3[%c5, %c0_21] : memref<9x256xf32, #tpu.memory_space<vmem>>, vector<1x256xf32>
    %c6 = arith.constant 6 : index
    %c0_22 = arith.constant 0 : index
    %18 = vector.load %arg3[%c6, %c0_22] : memref<9x256xf32, #tpu.memory_space<vmem>>, vector<1x256xf32>
    %c7_23 = arith.constant 7 : index
    %c0_24 = arith.constant 0 : index
    %19 = vector.load %arg3[%c7_23, %c0_24] : memref<9x256xf32, #tpu.memory_space<vmem>>, vector<1x256xf32>
    %c8_25 = arith.constant 8 : index
    %c0_26 = arith.constant 0 : index
    %20 = vector.load %arg3[%c8_25, %c0_26] : memref<9x256xf32, #tpu.memory_space<vmem>>, vector<1x256xf32>
    %c0_27 = arith.constant 0 : index
    %c0_28 = arith.constant 0 : index
    %21 = vector.load %arg4[%c0_27, %c0_28] : memref<1x256xf32, #tpu.memory_space<vmem>>, vector<1x256xf32>
    %c0_i32 = arith.constant 0 : i32
    %c2_i32 = arith.constant 2 : i32
    %22 = arith.addi %c0_i32, %c2_i32 : i32
    %c1_i32 = arith.constant 1 : i32
    scf.for %arg7 = %c0_i32 to %22 step %c1_i32  : i32 {
      %c2_i32_30 = arith.constant 2 : i32
      %23 = arith.muli %arg7, %c2_i32_30 : i32
      %cst_31 = arith.constant 0.000000e+00 : f32
      %24 = vector.broadcast %cst_31 : f32 to vector<32x256xf32>
      %25 = arith.index_cast %23 : i32 to index
      %c7_32 = arith.constant 7 : index
      %c0_33 = arith.constant 0 : index
      %26 = vector.load %arg6[%25, %c7_32, %c0_33] : memref<4x32x384xf32, #tpu.memory_space<vmem>>, vector<2x16x384xf32>
      %27 = vector.shape_cast %26 : vector<2x16x384xf32> to vector<32x384xf32>
      %c16_i32 = arith.constant 16 : i32
      %28 = tpu.dynamic_rotate %27 by %c16_i32 dim 1 : vector<32x384xf32>, i32 -> vector<32x384xf32>
      %29 = vector.extract_strided_slice %28 {offsets = [0, 0], sizes = [32, 256], strides = [1, 1]} : vector<32x384xf32> to vector<32x256xf32>
      %30 = vector.broadcast %12 : vector<1x256xf32> to vector<32x256xf32>
      %31 = arith.mulf %29, %30 : vector<32x256xf32>
      %32 = arith.addf %24, %31 : vector<32x256xf32>
      %33 = vector.extract_strided_slice %27 {offsets = [0, 0], sizes = [32, 256], strides = [1, 1]} : vector<32x384xf32> to vector<32x256xf32>
      %34 = vector.broadcast %13 : vector<1x256xf32> to vector<32x256xf32>
      %35 = arith.mulf %33, %34 : vector<32x256xf32>
      %36 = arith.addf %32, %35 : vector<32x256xf32>
      %c368_i32 = arith.constant 368 : i32
      %37 = tpu.dynamic_rotate %27 by %c368_i32 dim 1 : vector<32x384xf32>, i32 -> vector<32x384xf32>
      %38 = vector.extract_strided_slice %37 {offsets = [0, 0], sizes = [32, 256], strides = [1, 1]} : vector<32x384xf32> to vector<32x256xf32>
      %39 = vector.broadcast %14 : vector<1x256xf32> to vector<32x256xf32>
      %40 = arith.mulf %38, %39 : vector<32x256xf32>
      %41 = arith.addf %36, %40 : vector<32x256xf32>
      %42 = arith.index_cast %23 : i32 to index
      %c8_34 = arith.constant 8 : index
      %c0_35 = arith.constant 0 : index
      %43 = vector.load %arg6[%42, %c8_34, %c0_35] : memref<4x32x384xf32, #tpu.memory_space<vmem>>, vector<2x16x384xf32>
      %44 = vector.shape_cast %43 : vector<2x16x384xf32> to vector<32x384xf32>
      %c16_i32_36 = arith.constant 16 : i32
      %45 = tpu.dynamic_rotate %44 by %c16_i32_36 dim 1 : vector<32x384xf32>, i32 -> vector<32x384xf32>
      %46 = vector.extract_strided_slice %45 {offsets = [0, 0], sizes = [32, 256], strides = [1, 1]} : vector<32x384xf32> to vector<32x256xf32>
      %47 = vector.broadcast %15 : vector<1x256xf32> to vector<32x256xf32>
      %48 = arith.mulf %46, %47 : vector<32x256xf32>
      %49 = arith.addf %41, %48 : vector<32x256xf32>
      %50 = vector.extract_strided_slice %44 {offsets = [0, 0], sizes = [32, 256], strides = [1, 1]} : vector<32x384xf32> to vector<32x256xf32>
      %51 = vector.broadcast %16 : vector<1x256xf32> to vector<32x256xf32>
      %52 = arith.mulf %50, %51 : vector<32x256xf32>
      %53 = arith.addf %49, %52 : vector<32x256xf32>
      %c368_i32_37 = arith.constant 368 : i32
      %54 = tpu.dynamic_rotate %44 by %c368_i32_37 dim 1 : vector<32x384xf32>, i32 -> vector<32x384xf32>
      %55 = vector.extract_strided_slice %54 {offsets = [0, 0], sizes = [32, 256], strides = [1, 1]} : vector<32x384xf32> to vector<32x256xf32>
      %56 = vector.broadcast %17 : vector<1x256xf32> to vector<32x256xf32>
      %57 = arith.mulf %55, %56 : vector<32x256xf32>
      %58 = arith.addf %53, %57 : vector<32x256xf32>
      %59 = arith.index_cast %23 : i32 to index
      %c9 = arith.constant 9 : index
      %c0_38 = arith.constant 0 : index
      %60 = vector.load %arg6[%59, %c9, %c0_38] : memref<4x32x384xf32, #tpu.memory_space<vmem>>, vector<2x16x384xf32>
      %61 = vector.shape_cast %60 : vector<2x16x384xf32> to vector<32x384xf32>
      %c16_i32_39 = arith.constant 16 : i32
      %62 = tpu.dynamic_rotate %61 by %c16_i32_39 dim 1 : vector<32x384xf32>, i32 -> vector<32x384xf32>
      %63 = vector.extract_strided_slice %62 {offsets = [0, 0], sizes = [32, 256], strides = [1, 1]} : vector<32x384xf32> to vector<32x256xf32>
      %64 = vector.broadcast %18 : vector<1x256xf32> to vector<32x256xf32>
      %65 = arith.mulf %63, %64 : vector<32x256xf32>
      %66 = arith.addf %58, %65 : vector<32x256xf32>
      %67 = vector.extract_strided_slice %61 {offsets = [0, 0], sizes = [32, 256], strides = [1, 1]} : vector<32x384xf32> to vector<32x256xf32>
      %68 = vector.broadcast %19 : vector<1x256xf32> to vector<32x256xf32>
      %69 = arith.mulf %67, %68 : vector<32x256xf32>
      %70 = arith.addf %66, %69 : vector<32x256xf32>
      %c368_i32_40 = arith.constant 368 : i32
      %71 = tpu.dynamic_rotate %61 by %c368_i32_40 dim 1 : vector<32x384xf32>, i32 -> vector<32x384xf32>
      %72 = vector.extract_strided_slice %71 {offsets = [0, 0], sizes = [32, 256], strides = [1, 1]} : vector<32x384xf32> to vector<32x256xf32>
      %73 = vector.broadcast %20 : vector<1x256xf32> to vector<32x256xf32>
      %74 = arith.mulf %72, %73 : vector<32x256xf32>
      %75 = arith.addf %70, %74 : vector<32x256xf32>
      %76 = vector.broadcast %21 : vector<1x256xf32> to vector<32x256xf32>
      %77 = arith.addf %75, %76 : vector<32x256xf32>
      %78 = vector.shape_cast %77 : vector<32x256xf32> to vector<2x16x256xf32>
      %79 = arith.index_cast %23 : i32 to index
      %c0_41 = arith.constant 0 : index
      %c0_42 = arith.constant 0 : index
      %80 = vector.load %arg5[%79, %c0_41, %c0_42] : memref<4x16x256xf32, #tpu.memory_space<vmem>>, vector<2x16x256xf32>
      tpu.vector_store %arg5[%79, %c0_41, %c0_42], %78 {strides = array<i32>} : memref<4x16x256xf32, #tpu.memory_space<vmem>>, vector<2x16x256xf32>,
    }
    %c2_i32_29 = arith.constant 2 : i32
    return
  }
  func.func @transform_0(%arg0: i32) -> (i32, i32, i32) {
    %c0_i32 = arith.constant 0 : i32
    %c0_i32_0 = arith.constant 0 : i32
    %c0_i32_1 = arith.constant 0 : i32
    return %arg0, %c0_i32, %c0_i32_0 : i32, i32, i32
  }
  func.func @transform_1(%arg0: i32) -> (i32, i32) {
    %c0_i32 = arith.constant 0 : i32
    %c0_i32_0 = arith.constant 0 : i32
    %c0_i32_1 = arith.constant 0 : i32
    return %c0_i32, %c0_i32_0 : i32, i32
  }
  func.func @transform_2(%arg0: i32) -> (i32, i32) {
    %c0_i32 = arith.constant 0 : i32
    %c0_i32_0 = arith.constant 0 : i32
    %c0_i32_1 = arith.constant 0 : i32
    return %c0_i32, %c0_i32_0 : i32, i32
  }
  func.func @transform_3(%arg0: i32) -> (i32, i32) {
    %c0_i32 = arith.constant 0 : i32
    %c0_i32_0 = arith.constant 0 : i32
    %c0_i32_1 = arith.constant 0 : i32
    return %c0_i32, %c0_i32_0 : i32, i32
  }
  func.func @transform_4(%arg0: i32) -> (i32, i32, i32) {
    %c0_i32 = arith.constant 0 : i32
    %c0_i32_0 = arith.constant 0 : i32
    %c0_i32_1 = arith.constant 0 : i32
    return %arg0, %c0_i32, %c0_i32_0 : i32, i32, i32
  }
}

</mosaic_0001>

<bundles_post_ra>
// kernel: tile.13
= control target key start
LH: loop header
LB: loop body
LE: loop exit
PB: predicated region body
PF: predicated region fallthrough
CT: control target
= control target key end

     0   :  { %s81_s6 = smov 3  ;;  %s36_s9 = smov 3  ;;  %vm41_vm0 = vcmask 1043458   ;;  %vm46_vm1 = vcmask 1045508   ;;  %vm51_vm2 = vcmask 1047558   ;;  %vm4_vm3 = vcmask 1047556   ;;  %s878_s0 = inlined_call_operand.vmem [shape: f32[9,16,16], index: 0, kind: input, shape index: {}]   ;;  %s879_s1 = inlined_call_operand.vmem [shape: f32[9,256], index: 1, kind: output, shape index: {}]  }
   0x1   :  { %v426_v0 = vld [vmem:[%s878_s0 + $0x87] ss:$8 sm:%s81_s6]   ;;  %s39_s10 = smov 12  ;;  %s501_s11 = smov 112   ;;  %vm6_vm4 = vcmask 130048   ;;  %vm55_vm5 = vcmask 1048448  }
   0x2   :  { %83 = vrot.lane.b32.xlu1 %v426_v0, %s501_s11  ;;  %v417_v1 = vld [vmem:[%s878_s0 + $0x7] ss:$16 sm:%s36_s9]   ;;  %s44_s14 = smov 48  ;;  %s49_s15 = smov 192  ;;  %vm108_vm6 = vcmask 917248   ;;  %vm161_vm7 = vcmask 786048  }
   0x3   :  { %v418_v2 = vld [vmem:[%s878_s0 + $0x7] ss:$16 sm:%s39_s10]   ;;  %s89_s20 = smov 3  ;;  %s92_s21 = smov 12  ;;  %vm214_vm8 = vcmask 654848   ;;  %vm267_vm9 = vcmask 523648  }
   0x4   :  { %v419_v3 = vld [vmem:[%s878_s0 + $0x7] ss:$16 sm:%s44_s14]   ;;  %v42_v4 = vsel %vm41_vm0, %v418_v2, %v417_v1  ;;  %v428_v6 = vld [vmem:[%s878_s0 + $0x6] ss:$16 sm:%s89_s20]   ;;  %s97_s26 = smov 48  ;;  %s102_s27 = smov 192 }
   0x5   :  { %v420_v5 = vld [vmem:[%s878_s0 + $0x7] ss:$16 sm:%s49_s15]   ;;  %v47_v7 = vsel %vm46_vm1, %v419_v3, %v42_v4  ;;  %v429_v8 = vld [vmem:[%s878_s0 + $0x6] ss:$16 sm:%s92_s21]   ;;  %s58_s3 = smov 3  ;;  %s61_s8 = smov 12 }
   0x6   :  { %v430_v9 = vld [vmem:[%s878_s0 + $0x6] ss:$16 sm:%s97_s26]   ;;  %v52_v10 = vsel %vm51_vm2, %v420_v5, %v47_v7  ;;  %v95_v11 = vsel %vm41_vm0, %v429_v8, %v428_v6  ;;  %v421_v13 = vld [vmem:[%s878_s0 + $0xf] ss:$16 sm:%s58_s3]   ;;  %s66_s9 = smov 48  ;;  %s71_s13 = smov 192 }
   0x7   :  { %v431_v12 = vld [vmem:[%s878_s0 + $0x6] ss:$16 sm:%s102_s27]   ;;  %53 = vrot.lane.b32.xlu0 %v52_v10, %s501_s11  ;;  %v100_v14 = vsel %vm46_vm1, %v430_v9, %v95_v11  ;;  %s164_s18 = smov 3  ;;  %s167_s19 = smov 12  ;;  %vm320_vm10 = vcmask 392448   ;;  %vm373_vm11 = vcmask 261248  }
   0x8   :  { %v422_v15 = vld [vmem:[%s878_s0 + $0xf] ss:$16 sm:%s61_s8]   ;;  %v105_v16 = vsel %vm51_vm2, %v431_v12, %v100_v14  ;;  %v443_v21 = vld [vmem:[%s878_s0 + $0xd] ss:$16 sm:%s164_s18]   ;;  %s172_s24 = smov 48  ;;  %s177_s25 = smov 192 }
   0x9   :  { %v64_v17 = vsel %vm41_vm0, %v422_v15, %v421_v13  ;;  %v423_v18 = vld [vmem:[%s878_s0 + $0xf] ss:$16 sm:%s66_s9]   ;;  %v444_v22 = vld [vmem:[%s878_s0 + $0xd] ss:$16 sm:%s167_s19]   ;;  %s502_s26 = smov 96   ;;  %s142_s29 = smov 3 }
   0xa   :  { %v424_v19 = vld [vmem:[%s878_s0 + $0xf] ss:$16 sm:%s71_s13]   ;;  %v69_v20 = vsel %vm46_vm1, %v423_v18, %v64_v17  ;;  %106 = vrot.lane.b32.xlu1 %v105_v16, %s502_s26  ;;  %v170_v23 = vsel %vm41_vm0, %v444_v22, %v443_v21  ;;  %s145_s30 = smov 12  ;;  %s150_s4 = smov 48 }
   0xb   :  { %v445_v24 = vld [vmem:[%s878_s0 + $0xd] ss:$16 sm:%s172_s24]   ;;  %v439_v25 = vld [vmem:[%s878_s0 + $0x5] ss:$16 sm:%s142_s29]   ;;  %v74_v26 = vsel %vm51_vm2, %v424_v19, %v69_v20  ;;  %s111_s9 = smov 3  ;;  %s114_s10 = smov 12 }
   0xc   :  { %v175_v27 = vsel %vm46_vm1, %v445_v24, %v170_v23  ;;  %v446_v28 = vld [vmem:[%s878_s0 + $0xd] ss:$16 sm:%s177_s25]   ;;  %v440_v29 = vld [vmem:[%s878_s0 + $0x5] ss:$16 sm:%s145_s30]   ;;  %s119_s16 = smov 48  ;;  %s124_s17 = smov 192 }
   0xd   :  { %v441_v30 = vld [vmem:[%s878_s0 + $0x5] ss:$16 sm:%s150_s4]   ;;  %v432_v31 = vld [vmem:[%s878_s0 + $0xe] ss:$16 sm:%s111_s9]   ;;  %v148_v32 = vsel %vm41_vm0, %v440_v29, %v439_v25  ;;  %s155_s18 = smov 192  ;;  %s217_s23 = smov 3  ;;  %v180_v35 = vsel %vm51_vm2, %v446_v28, %v175_v27 }
   0xe   :  { %v433_v33 = vld [vmem:[%s878_s0 + $0xe] ss:$16 sm:%s114_s10]   ;;  %s220_s25 = smov 12  ;;  %s225_s27 = smov 48  ;;  %v454_v39 = vld [vmem:[%s878_s0 + $0xc] ss:$16 sm:%s217_s23]   ;;  %v153_v41 = vsel %vm46_vm1, %v441_v30, %v148_v32 }
   0xf   :  { %v434_v34 = vld [vmem:[%s878_s0 + $0xe] ss:$16 sm:%s119_s16]   ;;  %75 = vrot.lane.b32.xlu0 %v74_v26, %s501_s11  ;;  %v117_v36 = vsel %vm41_vm0, %v433_v33, %v432_v31  ;;  %s195_s3 = smov 3  ;;  %s230_s8 = smov 192 }
  0x10   :  { %v435_v37 = vld [vmem:[%s878_s0 + $0xe] ss:$16 sm:%s124_s17]   ;;  %v122_v38 = vsel %vm46_vm1, %v434_v34, %v117_v36  ;;  %v455_v40 = vld [vmem:[%s878_s0 + $0xc] ss:$16 sm:%s220_s25]   ;;  %s198_s9 = smov 12  ;;  %s503_s10 = smov 80  }
  0x11   :  { %v442_v42 = vld [vmem:[%s878_s0 + $0x5] ss:$16 sm:%s155_s18]   ;;  %v127_v43 = vsel %vm51_vm2, %v435_v37, %v122_v38  ;;  %v223_v44 = vsel %vm41_vm0, %v455_v40, %v454_v39  ;;  %v456_v45 = vld [vmem:[%s878_s0 + $0xc] ss:$16 sm:%s225_s27]   ;;  %s203_s12 = smov 48  ;;  %s270_s17 = smov 3 }
  0x12   :  { %181 = vrot.lane.b32.xlu1 %v180_v35, %s503_s10  ;;  %128 = vrot.lane.b32.xlu2 %v127_v43, %s502_s26  ;;  %v450_v46 = vld [vmem:[%s878_s0 + $0x4] ss:$16 sm:%s195_s3]   ;;  %v158_v48 = vsel %vm51_vm2, %v442_v42, %v153_v41  ;;  %v228_v49 = vsel %vm46_vm1, %v456_v45, %v223_v44  ;;  %s134_s20 = smov 3  ;;  %s273_s21 = smov 12 }
  0x13   :  { %v451_v47 = vld [vmem:[%s878_s0 + $0x4] ss:$16 sm:%s198_s9]   ;;  %v457_v50 = vld [vmem:[%s878_s0 + $0xc] ss:$16 sm:%s230_s8]   ;;  %s208_s11 = smov 192  ;;  %s278_s29 = smov 48 }
  0x14   :  { %v452_v51 = vld [vmem:[%s878_s0 + $0x4] ss:$16 sm:%s203_s12]   ;;  %v201_v52 = vsel %vm41_vm0, %v451_v47, %v450_v46  ;;  %v465_v53 = vld [vmem:[%s878_s0 + $0xb] ss:$16 sm:%s270_s17]   ;;  %v233_v55 = vsel %vm51_vm2, %v457_v50, %v228_v49  ;;  %s248_s3 = smov 3  ;;  %s251_s4 = smov 12 }
  0x15   :  { %v466_v54 = vld [vmem:[%s878_s0 + $0xb] ss:$16 sm:%s273_s21]   ;;  %v437_v56 = vld [vmem:[%s878_s0 + $0x86] ss:$8 sm:%s134_s20]   ;;  %v206_v57 = vsel %vm46_vm1, %v452_v51, %v201_v52  ;;  %s283_s9 = smov 192  ;;  %s504_s12 = smov 64  }
  0x16   :  { %v453_v58 = vld [vmem:[%s878_s0 + $0x4] ss:$16 sm:%s208_s11]   ;;  %v276_v59 = vsel %vm41_vm0, %v466_v54, %v465_v53  ;;  %v467_v60 = vld [vmem:[%s878_s0 + $0xb] ss:$16 sm:%s278_s29]   ;;  %s323_s17 = smov 3  ;;  %s326_s18 = smov 12 }
  0x17   :  { %159 = vrot.lane.b32.xlu0 %v158_v48, %s503_s10  ;;  %v461_v61 = vld [vmem:[%s878_s0 + $0x3] ss:$16 sm:%s248_s3]   ;;  %v211_v63 = vsel %vm51_vm2, %v453_v58, %v206_v57  ;;  %v281_v0 = vsel %vm46_vm1, %v467_v60, %v276_v59  ;;  %s187_s21 = smov 3  ;;  %s261_s11 = smov 192 }
  0x18   :  { %v462_v62 = vld [vmem:[%s878_s0 + $0x3] ss:$16 sm:%s251_s4]   ;;  %v468_v1 = vld [vmem:[%s878_s0 + $0xb] ss:$16 sm:%s283_s9]   ;;  %s331_s29 = smov 48  ;;  %s301_s3 = smov 3 }
  0x19   :  { %v254_v3 = vsel %vm41_vm0, %v462_v62, %v461_v61  ;;  %v476_v4 = vld [vmem:[%s878_s0 + $0xa] ss:$16 sm:%s323_s17]   ;;  %v286_v6 = vsel %vm51_vm2, %v468_v1, %v281_v0  ;;  %v448_v7 = vld [vmem:[%s878_s0 + $0x85] ss:$8 sm:%s187_s21]   ;;  %s304_s4 = smov 12  ;;  %s336_s9 = smov 192 }
  0x1a   :  { %234 = vrot.lane.b32.xlu1 %v233_v55, %s504_s12  ;;  %136 = vrot.lane.b32.xlu2 %v437_v56, %s502_s26  ;;  %s256_s26 = smov 48  ;;  %v477_v5 = vld [vmem:[%s878_s0 + $0xa] ss:$16 sm:%s326_s18]   ;;  %s376_s17 = smov 3 }
  0x1b   :  { %v463_v2 = vld [vmem:[%s878_s0 + $0x3] ss:$16 sm:%s256_s26]   ;;  %v329_v10 = vsel %vm41_vm0, %v477_v5, %v476_v4  ;;  %v478_v11 = vld [vmem:[%s878_s0 + $0xa] ss:$16 sm:%s331_s29]   ;;  %s505_s26 = smov 48   ;;  %s379_s18 = smov 12 }
  0x1c   :  { %v259_v8 = vsel %vm46_vm1, %v463_v2, %v254_v3  ;;  %v464_v9 = vld [vmem:[%s878_s0 + $0x3] ss:$16 sm:%s261_s11]   ;;  %v472_v12 = vld [vmem:[%s878_s0 + $0x2] ss:$16 sm:%s301_s3]   ;;  %v334_v15 = vsel %vm46_vm1, %v478_v11, %v329_v10  ;;  %s240_s21 = smov 3  ;;  %s314_s11 = smov 192 }
  0x1d   :  { %v473_v13 = vld [vmem:[%s878_s0 + $0x2] ss:$16 sm:%s304_s4]   ;;  %v264_v14 = vsel %vm51_vm2, %v464_v9, %v259_v8  ;;  %v479_v16 = vld [vmem:[%s878_s0 + $0xa] ss:$16 sm:%s336_s9]   ;;  %s384_s29 = smov 48  ;;  %s354_s3 = smov 3 }
  0x1e   :  { %v307_v18 = vsel %vm41_vm0, %v473_v13, %v472_v12  ;;  %v487_v19 = vld [vmem:[%s878_s0 + $0x9] ss:$16 sm:%s376_s17]   ;;  %v339_v21 = vsel %vm51_vm2, %v479_v16, %v334_v15  ;;  %v459_v22 = vld [vmem:[%s878_s0 + $0x84] ss:$8 sm:%s240_s21]   ;;  %s357_s4 = smov 12  ;;  %s389_s9 = smov 192 }
  0x1f   :  { %212 = vrot.lane.b32.xlu0 %v211_v63, %s504_s12  ;;  %v488_v20 = vld [vmem:[%s878_s0 + $0x9] ss:$16 sm:%s379_s18]   ;;  %s362_s16 = smov 48  ;;  %s293_s19 = smov 3 }
  0x20   :  { %v475_v24 = vld [vmem:[%s878_s0 + $0x2] ss:$16 sm:%s314_s11]   ;;  %v382_v25 = vsel %vm41_vm0, %v488_v20, %v487_v19  ;;  %v489_v26 = vld [vmem:[%s878_s0 + $0x9] ss:$16 sm:%s384_s29]   ;;  %s367_s22 = smov 192  ;;  %s507_s27 = smov 16  }
  0x21   :  { %v483_v27 = vld [vmem:[%s878_s0 + $0x1] ss:$16 sm:%s354_s3]   ;;  %v387_v30 = vsel %vm46_vm1, %v489_v26, %v382_v25  ;;  %v490_v31 = vld [vmem:[%s878_s0 + $0x9] ss:$16 sm:%s389_s9]   ;;  %s399_s30 = smov 3  ;;  %s30_s21 = smov 3 }
  0x22   :  { %287 = vrot.lane.b32.xlu1 %v286_v6, %s505_s26  ;;  %189 = vrot.lane.b32.xlu2 %v448_v7, %s503_s10  ;;  %s309_s10 = smov 48  ;;  %v484_v28 = vld [vmem:[%s878_s0 + $0x1] ss:$16 sm:%s357_s4]   ;;  %v392_v34 = vsel %vm51_vm2, %v490_v31, %v387_v30 }
  0x23   :  { %v474_v17 = vld [vmem:[%s878_s0 + $0x2] ss:$16 sm:%s309_s10]   ;;  %s506_s10 = smov 32   ;;  %v360_v32 = vsel %vm41_vm0, %v484_v28, %v483_v27  ;;  %v485_v33 = vld [vmem:[%s878_s0 + $0x1] ss:$16 sm:%s362_s16]  }
  0x24   :  { %v312_v23 = vsel %vm46_vm1, %v474_v17, %v307_v18  ;;  %v470_v35 = vld [vmem:[%s878_s0 + $0x83] ss:$8 sm:%s293_s19]   ;;  %v365_v36 = vsel %vm46_vm1, %v485_v33, %v360_v32  ;;  %v486_v37 = vld [vmem:[%s878_s0 + $0x1] ss:$16 sm:%s367_s22]  }
  0x25   :  { %v317_v29 = vsel %vm51_vm2, %v475_v24, %v312_v23  ;;  %v370_v38 = vsel %vm51_vm2, %v486_v37, %v365_v36  ;;  %v492_v40 = vld [vmem:[%s878_s0 + $0x81] ss:$8 sm:%s399_s30]   ;;  %v2_v41 = vld [vmem:[%s878_s0] ss:$8 sm:$0xf]  }
  0x26   :  { %v3_v42 = vld [vmem:[%s878_s0] ss:$8 sm:$0xf0]  }
  0x27   :  { %265 = vrot.lane.b32.xlu0 %v264_v14, %s505_s26  ;;  %v5_v43 = vsel %vm4_vm3, %v3_v42, %v2_v41  ;;  %v409_v44 = vld [vmem:[%s878_s0 + $0x40] ss:$8 sm:$0xf]  }
  0x28   :  { %v410_v45 = vld [vmem:[%s878_s0 + $0x40] ss:$8 sm:$0xf0]   ;;  %7 = vst.msk [vmem:[%s879_s1] ss:$8 sm:$0x3] %vm6_vm4, %v5_v43  }
  0x29   :  { %406 = vst.msk [vmem:[%s879_s1 - $0xf] ss:$8 sm:$0xc] %vm6_vm4, %v5_v43   ;;  %v19_v46 = vsel %vm4_vm3, %v410_v45, %v409_v44  ;;  %v415_v47 = vld [vmem:[%s878_s0 + $0x80] ss:$8 sm:%s30_s21]  }
  0x2a   :  { %340 = vrot.lane.b32.xlu1 %v339_v21, %s506_s10  ;;  %242 = vrot.lane.b32.xlu2 %v459_v22, %s504_s12  ;;  %407 = vst.msk [vmem:[%s879_s1 - $0x1e] ss:$8 sm:$0x30] %vm6_vm4, %v5_v43  }
  0x2b   :  { %408 = vst.msk [vmem:[%s879_s1 - $0x2d] ss:$8 sm:$0xc0] %vm6_vm4, %v5_v43  }
  0x2c   :  { %411 = vst.msk [vmem:[%s879_s1 + $0x4] ss:$8 sm:$0x3] %vm6_vm4, %v19_v46  }
  0x2d   :  { %412 = vst.msk [vmem:[%s879_s1 - $0xb] ss:$8 sm:$0xc] %vm6_vm4, %v19_v46  }
  0x2e   :  { %413 = vst.msk [vmem:[%s879_s1 - $0x1a] ss:$8 sm:$0x30] %vm6_vm4, %v19_v46  }
  0x2f   :  { %318 = vrot.lane.b32.xlu0 %v317_v29, %s506_s10  ;;  %414 = vst.msk [vmem:[%s879_s1 - $0x29] ss:$8 sm:$0xc0] %vm6_vm4, %v19_v46  }
  0x30   :  { %416 = vst.msk [vmem:[%s879_s1 + $0x10] ss:$8 sm:$0x3] %vm6_vm4, %v415_v47  }
  0x32   :  { %393 = vrot.lane.b32.xlu1 %v392_v34, %s507_s27  ;;  %295 = vrot.lane.b32.xlu2 %v470_v35, %s505_s26  ;;  %s346_s26 = smov 3 }
  0x33   :  { %v481_v39 = vld [vmem:[%s878_s0 + $0x82] ss:$8 sm:%s346_s26]  }
  0x37   :  { %371 = vrot.lane.b32.xlu0 %v370_v38, %s507_s27 }
  0x3a   :  { %348 = vrot.lane.b32.xlu2 %v481_v39, %s506_s10 }
  0x42   :  { %401 = vrot.lane.b32.xlu2 %v492_v40, %s507_s27 }
  0x6c   :  { %v129_v48 = vpop.permute.xlu2 %128  }
  0x74   :  { %v84_v49 = vpop.permute.xlu1 %83   ;;  %v137_v50 = vpop.permute.xlu2 %136  }
  0x75   :  { %427 = vst.msk [vmem:[%s879_s1 + $0x10] ss:$8 sm:$0x3] %vm55_vm5, %v84_v49  }
  0x76   :  { %438 = vst.msk [vmem:[%s879_s1 + $0x10] ss:$8 sm:$0x3] %vm108_vm6, %v137_v50  }
  0x79   :  { %v54_v51 = vpop.permute.xlu0 %53  }
  0x7a   :  { %56 = vst.msk [vmem:[%s879_s1] sm:$0xff] %vm55_vm5, %v54_v51  }
  0x7c   :  { %v107_v52 = vpop.permute.xlu1 %106   ;;  %v190_v53 = vpop.permute.xlu2 %189  }
  0x7d   :  { %109 = vst.msk [vmem:[%s879_s1] sm:$0xff] %vm108_vm6, %v107_v52  }
  0x7e   :  { %449 = vst.msk [vmem:[%s879_s1 + $0x10] ss:$8 sm:$0x3] %vm161_vm7, %v190_v53  }
  0x81   :  { %v76_v54 = vpop.permute.xlu0 %75  }
  0x82   :  { %425 = vst.msk [vmem:[%s879_s1 + $0x8] sm:$0xff] %vm55_vm5, %v76_v54  }
  0x83   :  { %436 = vst.msk [vmem:[%s879_s1 + $0x8] sm:$0xff] %vm108_vm6, %v129_v48  }
  0x84   :  { %v182_v55 = vpop.permute.xlu1 %181   ;;  %v243_v56 = vpop.permute.xlu2 %242  }
  0x85   :  { %447 = vst.msk [vmem:[%s879_s1 + $0x8] sm:$0xff] %vm161_vm7, %v182_v55  }
  0x86   :  { %460 = vst.msk [vmem:[%s879_s1 + $0x10] ss:$8 sm:$0x3] %vm214_vm8, %v243_v56  }
  0x89   :  { %v160_v57 = vpop.permute.xlu0 %159  }
  0x8a   :  { %162 = vst.msk [vmem:[%s879_s1] sm:$0xff] %vm161_vm7, %v160_v57  }
  0x8c   :  { %v235_v58 = vpop.permute.xlu1 %234   ;;  %v296_v59 = vpop.permute.xlu2 %295  }
  0x8d   :  { %458 = vst.msk [vmem:[%s879_s1 + $0x8] sm:$0xff] %vm214_vm8, %v235_v58  }
  0x8e   :  { %471 = vst.msk [vmem:[%s879_s1 + $0x10] ss:$8 sm:$0x3] %vm267_vm9, %v296_v59  }
  0x91   :  { %v213_v60 = vpop.permute.xlu0 %212  }
  0x92   :  { %215 = vst.msk [vmem:[%s879_s1] sm:$0xff] %vm214_vm8, %v213_v60  }
  0x94   :  { %v288_v61 = vpop.permute.xlu1 %287   ;;  %v349_v62 = vpop.permute.xlu2 %348  }
  0x95   :  { %469 = vst.msk [vmem:[%s879_s1 + $0x8] sm:$0xff] %vm267_vm9, %v288_v61  }
  0x96   :  { %482 = vst.msk [vmem:[%s879_s1 + $0x10] ss:$8 sm:$0x3] %vm320_vm10, %v349_v62  }
  0x99   :  { %v266_v63 = vpop.permute.xlu0 %265  }
  0x9a   :  { %268 = vst.msk [vmem:[%s879_s1] sm:$0xff] %vm267_vm9, %v266_v63  }
  0x9c   :  { %v341_v0 = vpop.permute.xlu1 %340   ;;  %v402_v1 = vpop.permute.xlu2 %401  }
  0x9d   :  { %480 = vst.msk [vmem:[%s879_s1 + $0x8] sm:$0xff] %vm320_vm10, %v341_v0  }
  0x9e   :  { %493 = vst.msk [vmem:[%s879_s1 + $0x10] ss:$8 sm:$0x3] %vm373_vm11, %v402_v1  }
  0xa1   :  { %v319_v2 = vpop.permute.xlu0 %318  }
  0xa2   :  { %321 = vst.msk [vmem:[%s879_s1] sm:$0xff] %vm320_vm10, %v319_v2  }
  0xa4   :  { %v394_v3 = vpop.permute.xlu1 %393  }
  0xa5   :  { %491 = vst.msk [vmem:[%s879_s1 + $0x8] sm:$0xff] %vm373_vm11, %v394_v3  }
  0xa9   :  { %v372_v4 = vpop.permute.xlu0 %371  }
  0xaa   :  { %374 = vst.msk [vmem:[%s879_s1] sm:$0xff] %vm373_vm11, %v372_v4  }

// kernel: gseparable_conv2d_forward.1
= control target key start
LH: loop header
LB: loop body
LE: loop exit
PB: predicated region body
PF: predicated region fallthrough
CT: control target
= control target key end

     0   :  { %s1570_s15 = smov 0   ;;  %s2410_s0 = inlined_call_operand.vmem [shape: bf16[8,16,256], index: 0, kind: input, shape index: {}]   ;;  %s2411_s1 = inlined_call_operand.vmem [shape: bf16[256,256], index: 1, kind: input, shape index: {}]   ;;  %s2412_s2 = inlined_call_operand.vmem [shape: f32[9,256], index: 2, kind: input, shape index: {}]   ;;  %s2413_s3 = inlined_call_operand.vmem [shape: f32[1,256], index: 3, kind: input, shape index: {}]   ;;  %s2414_s4 = inlined_call_operand.vmem [shape: f32[8,16,256], index: 4, kind: output, shape index: {}]  }
   0x1 LB: > { %s1276_s16 = sadd.s32 4294967295, %s1536_s15   ;;  %p1280_p0 = scmp.ge.s32.totalorder %s1536_s15, 1  ;;  %s1536_s15 = sphi %s1570_s15, %s14_s15  }
   0x2   : > { %p164_p1 = scmp.lt.s32.totalorder %s1536_s15, 3 }
   0x4   : > { %p165_p2 = pnand %p1280_p0, %p164_p1 }
   0x5   : > { %s1281_s29 = sshll.u32 (!%p165_p2), %s1276_s16, 2  ;;  %s1869_s28 = smov (!%p165_p2), 0  }
   0x6   : > { %168 = sbr.rel (%p165_p2) target bundleno = 556 (0x22c), region = 36  ;;  %p193_p3 = scmp.lt.s32.totalorder (!%p165_p2), %s1281_s29, 7 }
   0xb   : > { %v1377_v0 = vld [vmem:[%s2411_s1 + $0x70] sm:$0xf]  ;;  %v1487_v1 = vld [vmem:[%s2411_s1 + $0x74] sm:$0xf0]  ;;  %v1486_v5 = vld [vmem:[%s2411_s1 + $0x74] sm:$0xf] }
   0xc   : > { %v1441_v2 = vld [vmem:[%s2411_s1 + $0xf0] sm:$0xf]  ;;  %v1378_v3 = vor.u32 %v1487_v1, %v1377_v0  ;;  %v1503_v4 = vld [vmem:[%s2411_s1 + $0xf4] sm:$0xf0]  ;;  %v1379_v6 = vld [vmem:[%s2411_s1 + $0x78] sm:$0xf0] }
   0xd   : > { %v1442_v7 = vor.u32 %v1503_v4, %v1441_v2  ;;  %v1382_v8 = vor.u32 %v1486_v5, %v1379_v6  ;;  %v1502_v9 = vld [vmem:[%s2411_s1 + $0xf4] sm:$0xf]  ;;  %v1443_v10 = vld [vmem:[%s2411_s1 + $0xf8] sm:$0xf0]  ;;  %v1369_v11 = vld [vmem:[%s2411_s1 + $0x60] sm:$0xf] }
   0xe   : > { %446 = vmatpush.bf16.msra.mxu0 %v1378_v3  ;;  %v1446_v12 = vor.u32 %v1502_v9, %v1443_v10  ;;  %v1485_v13 = vld [vmem:[%s2411_s1 + $0x64] sm:$0xf0]  ;;  %v1433_v14 = vld [vmem:[%s2411_s1 + $0xe0] sm:$0xf]  ;;  %v1484_v18 = vld [vmem:[%s2411_s1 + $0x64] sm:$0xf] }
   0xf   : > { %v1501_v15 = vld [vmem:[%s2411_s1 + $0xe4] sm:$0xf0]  ;;  %475 = vmatpush.bf16.msra.mxu1 %v1442_v7  ;;  %504 = vmatpush.bf16.msra.mxu2 %v1382_v8  ;;  %v1370_v16 = vor.u32 %v1485_v13, %v1369_v11  ;;  %v1371_v19 = vld [vmem:[%s2411_s1 + $0x68] sm:$0xf0]  ;;  %v1500_v20 = vld [vmem:[%s2411_s1 + $0xe4] sm:$0xf] }
  0x10   : > { %v1434_v17 = vor.u32 %v1501_v15, %v1433_v14  ;;  %533 = vmatpush.bf16.msra.mxu3 %v1446_v12  ;;  %v1374_v21 = vor.u32 %v1484_v18, %v1371_v19  ;;  %v1435_v22 = vld [vmem:[%s2411_s1 + $0xe8] sm:$0xf0]  ;;  %v1361_v23 = vld [vmem:[%s2411_s1 + $0x50] sm:$0xf]  ;;  %v1483_v24 = vld [vmem:[%s2411_s1 + $0x54] sm:$0xf0] }
  0x11   : > { %v1438_v25 = vor.u32 %v1500_v20, %v1435_v22  ;;  %v1425_v26 = vld [vmem:[%s2411_s1 + $0xd0] sm:$0xf]  ;;  %v1499_v27 = vld [vmem:[%s2411_s1 + $0xd4] sm:$0xf0]  ;;  %v1482_v28 = vld [vmem:[%s2411_s1 + $0x54] sm:$0xf]  ;;  %v1362_v29 = vor.u32 %v1483_v24, %v1361_v23 }
  0x12   : > { %447 = vmatpush.bf16.msra.mxu0 %v1370_v16  ;;  %v1363_v30 = vld [vmem:[%s2411_s1 + $0x58] sm:$0xf0]  ;;  %v1498_v31 = vld [vmem:[%s2411_s1 + $0xd4] sm:$0xf]  ;;  %v1426_v33 = vor.u32 %v1499_v27, %v1425_v26  ;;  %v1353_v35 = vld [vmem:[%s2411_s1 + $0x40] sm:$0xf] }
  0x13   : > { %v1427_v32 = vld [vmem:[%s2411_s1 + $0xd8] sm:$0xf0]  ;;  %476 = vmatpush.bf16.msra.mxu1 %v1434_v17  ;;  %505 = vmatpush.bf16.msra.mxu2 %v1374_v21  ;;  %v1366_v34 = vor.u32 %v1482_v28, %v1363_v30  ;;  %v1481_v36 = vld [vmem:[%s2411_s1 + $0x44] sm:$0xf0]  ;;  %v1417_v37 = vld [vmem:[%s2411_s1 + $0xc0] sm:$0xf] }
  0x14   : > { %534 = vmatpush.bf16.msra.mxu3 %v1438_v25  ;;  %v1430_v38 = vor.u32 %v1498_v31, %v1427_v32  ;;  %v1497_v39 = vld [vmem:[%s2411_s1 + $0xc4] sm:$0xf0]  ;;  %v1480_v40 = vld [vmem:[%s2411_s1 + $0x44] sm:$0xf]  ;;  %v1355_v41 = vld [vmem:[%s2411_s1 + $0x48] sm:$0xf0]  ;;  %v1354_v44 = vor.u32 %v1481_v36, %v1353_v35 }
  0x15   : > { %v1496_v42 = vld [vmem:[%s2411_s1 + $0xc4] sm:$0xf]  ;;  %v1419_v43 = vld [vmem:[%s2411_s1 + $0xc8] sm:$0xf0]  ;;  %v1418_v45 = vor.u32 %v1497_v39, %v1417_v37  ;;  %v1358_v46 = vor.u32 %v1480_v40, %v1355_v41  ;;  %v1345_v47 = vld [vmem:[%s2411_s1 + $0x30] sm:$0xf] }
  0x16   : > { %448 = vmatpush.bf16.msra.mxu0 %v1362_v29  ;;  %v1479_v48 = vld [vmem:[%s2411_s1 + $0x34] sm:$0xf0]  ;;  %v1409_v49 = vld [vmem:[%s2411_s1 + $0xb0] sm:$0xf]  ;;  %v1422_v50 = vor.u32 %v1496_v42, %v1419_v43  ;;  %v1478_v52 = vld [vmem:[%s2411_s1 + $0x34] sm:$0xf] }
  0x17   : > { %477 = vmatpush.bf16.msra.mxu1 %v1426_v33  ;;  %506 = vmatpush.bf16.msra.mxu2 %v1366_v34  ;;  %v1495_v51 = vld [vmem:[%s2411_s1 + $0xb4] sm:$0xf0]  ;;  %v1347_v53 = vld [vmem:[%s2411_s1 + $0x38] sm:$0xf0]  ;;  %v1494_v54 = vld [vmem:[%s2411_s1 + $0xb4] sm:$0xf]  ;;  %v1346_v56 = vor.u32 %v1479_v48, %v1345_v47 }
  0x18   : > { %535 = vmatpush.bf16.msra.mxu3 %v1430_v38  ;;  %v1411_v55 = vld [vmem:[%s2411_s1 + $0xb8] sm:$0xf0]  ;;  %v1410_v57 = vor.u32 %v1495_v51, %v1409_v49  ;;  %v1350_v58 = vor.u32 %v1478_v52, %v1347_v53  ;;  %v1337_v59 = vld [vmem:[%s2411_s1 + $0x20] sm:$0xf]  ;;  %v1477_v60 = vld [vmem:[%s2411_s1 + $0x24] sm:$0xf0] }
  0x19   : > { %v1401_v61 = vld [vmem:[%s2411_s1 + $0xa0] sm:$0xf]  ;;  %v1414_v62 = vor.u32 %v1494_v54, %v1411_v55  ;;  %v1493_v63 = vld [vmem:[%s2411_s1 + $0xa4] sm:$0xf0]  ;;  %v1476_v0 = vld [vmem:[%s2411_s1 + $0x24] sm:$0xf]  ;;  %v1338_v4 = vor.u32 %v1477_v60, %v1337_v59 }
  0x1a   : > { %449 = vmatpush.bf16.msra.mxu0 %v1354_v44  ;;  %v1339_v1 = vld [vmem:[%s2411_s1 + $0x28] sm:$0xf0]  ;;  %v1492_v2 = vld [vmem:[%s2411_s1 + $0xa4] sm:$0xf]  ;;  %v1329_v5 = vld [vmem:[%s2411_s1 + $0x10] sm:$0xf]  ;;  %v1402_v6 = vor.u32 %v1493_v63, %v1401_v61 }
  0x1b   : > { %478 = vmatpush.bf16.msra.mxu1 %v1418_v45  ;;  %507 = vmatpush.bf16.msra.mxu2 %v1358_v46  ;;  %v1403_v3 = vld [vmem:[%s2411_s1 + $0xa8] sm:$0xf0]  ;;  %v1342_v7 = vor.u32 %v1476_v0, %v1339_v1  ;;  %v1475_v8 = vld [vmem:[%s2411_s1 + $0x14] sm:$0xf0]  ;;  %v1393_v9 = vld [vmem:[%s2411_s1 + $0x90] sm:$0xf] }
  0x1c   : > { %536 = vmatpush.bf16.msra.mxu3 %v1422_v50  ;;  %v1491_v10 = vld [vmem:[%s2411_s1 + $0x94] sm:$0xf0]  ;;  %v1406_v11 = vor.u32 %v1492_v2, %v1403_v3  ;;  %v1474_v12 = vld [vmem:[%s2411_s1 + $0x14] sm:$0xf]  ;;  %v1331_v13 = vld [vmem:[%s2411_s1 + $0x18] sm:$0xf0]  ;;  %v1330_v16 = vor.u32 %v1475_v8, %v1329_v5 }
  0x1d   : > { %v1490_v14 = vld [vmem:[%s2411_s1 + $0x94] sm:$0xf]  ;;  %v1395_v15 = vld [vmem:[%s2411_s1 + $0x98] sm:$0xf0]  ;;  %v1321_v17 = vld [vmem:[%s2411_s1] sm:$0xf]  ;;  %v1394_v18 = vor.u32 %v1491_v10, %v1393_v9  ;;  %v1334_v19 = vor.u32 %v1474_v12, %v1331_v13 }
  0x1e   : > { %450 = vmatpush.bf16.msra.mxu0 %v1346_v56  ;;  %v1473_v20 = vld [vmem:[%s2411_s1 + $0x4] sm:$0xf0]  ;;  %v1385_v21 = vld [vmem:[%s2411_s1 + $0x80] sm:$0xf]  ;;  %s2418_s29 = smov (!%p193_p3, %s1281_s29), 7  ;;  %v1398_v22 = vor.u32 %v1490_v14, %v1395_v15 }
  0x1f   : > { %479 = vmatpush.bf16.msra.mxu1 %v1410_v57  ;;  %508 = vmatpush.bf16.msra.mxu2 %v1350_v58  ;;  %v1489_v23 = vld [vmem:[%s2411_s1 + $0x84] sm:$0xf0]  ;;  %v1472_v24 = vld [vmem:[%s2411_s1 + $0x4] sm:$0xf]  ;;  %v1323_v25 = vld [vmem:[%s2411_s1 + $0x8] sm:$0xf0]  ;;  %v1322_v28 = vor.u32 %v1473_v20, %v1321_v17 }
  0x20   : > { %537 = vmatpush.bf16.msra.mxu3 %v1414_v62  ;;  %v1488_v26 = vld [vmem:[%s2411_s1 + $0x84] sm:$0xf]  ;;  %v1387_v27 = vld [vmem:[%s2411_s1 + $0x88] sm:$0xf0]  ;;  %s1462_s25 = sshll.u32 %s2418_s29, 4  ;;  %s1463_s26 = sshll.u32 %s2418_s29, 5  ;;  %v1386_v29 = vor.u32 %v1489_v23, %v1385_v21  ;;  %v1326_v30 = vor.u32 %v1472_v24, %v1323_v25 }
  0x21   : > { %s1775_s30 = scalar_lea.vmem %s2410_s0, %s1462_s25  ;;  %s1780_s7 = scalar_lea.vmem %s2414_s4, %s1463_s26  ;;  %v1390_v34 = vor.u32 %v1488_v26, %v1387_v27  ;;  %v1806_v20 = vld [vmem:[%s2413_s3] sm:$0x3]  ;;  %v1816_v23 = vld [vmem:[%s2412_s2 + $0x2] ss:$8 sm:$0x3] }
  0x22   : > { %451 = vmatpush.bf16.msra.mxu0 %v1338_v4  ;;  %v1289_v31 = vld [vmem:[%s1775_s30] sm:$0xf]  ;;  %v1465_v32 = vld [vmem:[%s1775_s30 + $0x4] sm:$0xf0]  ;;  %v1464_v33 = vld [vmem:[%s1775_s30 + $0x4] sm:$0xf] }
  0x23   : > { %480 = vmatpush.bf16.msra.mxu1 %v1402_v6  ;;  %509 = vmatpush.bf16.msra.mxu2 %v1342_v7  ;;  %v1291_v35 = vld [vmem:[%s1775_s30 + $0x8] sm:$0xf0]  ;;  %v1290_v36 = vor.u32 %v1465_v32, %v1289_v31  ;;  %v1297_v38 = vld [vmem:[%s1775_s30 + $0x10] sm:$0xf]  ;;  %v1467_v39 = vld [vmem:[%s1775_s30 + $0x14] sm:$0xf0] }
  0x24   : > { %538 = vmatpush.bf16.msra.mxu3 %v1406_v11  ;;  %v1294_v37 = vor.u32 %v1464_v33, %v1291_v35  ;;  %v1466_v40 = vld [vmem:[%s1775_s30 + $0x14] sm:$0xf]  ;;  %v1299_v41 = vld [vmem:[%s1775_s30 + $0x18] sm:$0xf0]  ;;  %v1298_v42 = vor.u32 %v1467_v39, %v1297_v38  ;;  %v1305_v44 = vld [vmem:[%s1775_s30 + $0x20] sm:$0xf] }
  0x25   : > { %v1302_v43 = vor.u32 %v1466_v40, %v1299_v41  ;;  %v1469_v45 = vld [vmem:[%s1775_s30 + $0x24] sm:$0xf0]  ;;  %v1468_v46 = vld [vmem:[%s1775_s30 + $0x24] sm:$0xf]  ;;  %v1307_v47 = vld [vmem:[%s1775_s30 + $0x28] sm:$0xf0] }
  0x26   : > { %452 = vmatpush.bf16.msra.mxu0 %v1330_v16  ;;  %v1306_v48 = vor.u32 %v1469_v45, %v1305_v44  ;;  %v1310_v49 = vor.u32 %v1468_v46, %v1307_v47  ;;  %v1313_v50 = vld [vmem:[%s1775_s30 + $0x30] sm:$0xf]  ;;  %v1471_v51 = vld [vmem:[%s1775_s30 + $0x34] sm:$0xf0]  ;;  %v1470_v52 = vld [vmem:[%s1775_s30 + $0x34] sm:$0xf] }
  0x27   : > { %481 = vmatpush.bf16.msra.mxu1 %v1394_v18  ;;  %510 = vmatpush.bf16.msra.mxu2 %v1334_v19  ;;  %v1315_v53 = vld [vmem:[%s1775_s30 + $0x38] sm:$0xf0]  ;;  %v1314_v54 = vor.u32 %v1471_v51, %v1313_v50  ;;  %v1801_v19 = vld [vmem:[%s2412_s2] ss:$8 sm:$0x3] }
  0x28   : > { %539 = vmatpush.bf16.msra.mxu3 %v1398_v22  ;;  %v1318_v55 = vor.u32 %v1470_v52, %v1315_v53  ;;  %v1811_v21 = vld [vmem:[%s2412_s2 + $0x1] ss:$8 sm:$0x3]  ;;  %v1542_v22 = vmov 0.0  }
  0x29   : > { %578 = vst [vmem:[#allocation2 + $0x28] sm:$0xff] %v1542_v22  ;;  %v1821_v24 = vld [vmem:[%s2412_s2 + $0x3] ss:$8 sm:$0x3] }
  0x2a   : > { %453 = vmatpush.bf16.msra.mxu0 %v1322_v28  ;;  %579 = vst [vmem:[#allocation2 + $0x40] sm:$0xff] %v1542_v22  ;;  %v1826_v26 = vld [vmem:[%s2412_s2 + $0x4] ss:$8 sm:$0x3] }
  0x2b   : > { %482 = vmatpush.bf16.msra.mxu1 %v1386_v29  ;;  %511 = vmatpush.bf16.msra.mxu2 %v1326_v30  ;;  %580 = vst [vmem:[#allocation2 + $0x88] sm:$0xff] %v1542_v22  ;;  %v586_v29 = vlaneseq  ;;  %v1831_v30 = vld [vmem:[%s2412_s2 + $0x5] ss:$8 sm:$0x3] }
  0x2c   : > { %540 = vmatpush.bf16.msra.mxu3 %v1390_v34  ;;  %581 = vst [vmem:[#allocation2 + $0xa0] sm:$0xff] %v1542_v22  ;;  %v1836_v33 = vld [vmem:[%s2412_s2 + $0x6] ss:$8 sm:$0x3] }
  0x2d   : > { %454 = vmatmul.bf16.vlgmr.msra.gmra.mxu0 %v1290_v36  ;;  %582 = vst [vmem:[#allocation2 + $0xe8] sm:$0xff] %v1542_v22  ;;  %v1841_v35 = vld [vmem:[%s2412_s2 + $0x7] ss:$8 sm:$0x3]  ;;  %vm1849_vm0 = vcmp.lt.s32.totalorder %v586_v29, 384 }
  0x2e   : > { %483 = vmatmul.bf16.vlgmr.msra.gmra.mxu1 %v1294_v37  ;;  %512 = vmatmul.bf16.vlgmr.msra.gmra.mxu2 %v1290_v36  ;;  %583 = vst [vmem:[#allocation2 + $0x100] sm:$0xff] %v1542_v22  ;;  %v1846_v36 = vld [vmem:[%s2412_s2 + $0x10] ss:$8 sm:$0x3] }
  0x2f   : > { %541 = vmatmul.bf16.vlgmr.msra.gmra.mxu3 %v1294_v37  ;;  %584 = vst [vmem:[#allocation2 + $0x148] sm:$0xff] %v1542_v22 }
  0x30   : > { %585 = vst [vmem:[#allocation2 + $0x160] sm:$0xff] %v1542_v22 }
  0x31   : > { %591 = vst.msk [vmem:[#allocation2 + $0x7] ss:$8 sm:$0x7] %vm1849_vm0, %v1542_v22 }
  0x32   : > { %594 = vst.msk [vmem:[#allocation2 + $0x67] ss:$8 sm:$0x7] %vm1849_vm0, %v1542_v22 }
  0x33   : > { %597 = vst.msk [vmem:[#allocation2 + $0xc7] ss:$8 sm:$0x7] %vm1849_vm0, %v1542_v22 }
  0x34   : > { %600 = vst.msk [vmem:[#allocation2 + $0x127] ss:$8 sm:$0x7] %vm1849_vm0, %v1542_v22 }
  0x35   : > { %603 = vst.msk [vmem:[#allocation2 + $0x48] ss:$8 sm:$0x7] %vm1849_vm0, %v1542_v22 }
  0x36   : > { %606 = vst.msk [vmem:[#allocation2 + $0xa8] ss:$8 sm:$0x7] %vm1849_vm0, %v1542_v22 }
  0x37   : > { %609 = vst.msk [vmem:[#allocation2 + $0x108] ss:$8 sm:$0x7] %vm1849_vm0, %v1542_v22 }
  0x38   : > { %612 = vst.msk [vmem:[#allocation2 + $0x168] ss:$8 sm:$0x7] %vm1849_vm0, %v1542_v22 }
  0x3d   : > { %459 = vmatmul.bf16.gmra.mxu0 %v1298_v42 }
  0x3e   : > { %488 = vmatmul.bf16.gmra.mxu1 %v1302_v43  ;;  %517 = vmatmul.bf16.gmra.mxu2 %v1298_v42 }
  0x3f   : > { %546 = vmatmul.bf16.gmra.mxu3 %v1302_v43 }
  0x4d   : > { %464 = vmatmul.bf16.gmra.mxu0 %v1306_v48 }
  0x4e   : > { %493 = vmatmul.bf16.gmra.mxu1 %v1310_v49  ;;  %522 = vmatmul.bf16.gmra.mxu2 %v1306_v48 }
  0x4f   : > { %551 = vmatmul.bf16.gmra.mxu3 %v1310_v49 }
  0x5d   : > { %469 = vmatmul.bf16.gmra.mxu0 %v1314_v54 }
  0x5e   : > { %498 = vmatmul.bf16.gmra.mxu1 %v1318_v55  ;;  %527 = vmatmul.bf16.gmra.mxu2 %v1314_v54 }
  0x5f   : > { %556 = vmatmul.bf16.gmra.mxu3 %v1318_v55 }
  0xaa   : > { %v455_v56 = vpop.f32.mrf.mxu0 }
  0xab   : > { %v484_v57 = vpop.f32.mrf.mxu1 }
  0xac   : > { %v485_v58 = vadd.f32 %v484_v57, %v455_v56 }
  0xae   : > { %562 = vst [vmem:[#allocation2 + $0x18] sm:$0xff] %v485_v58 }
  0xb1   : > { %v513_v59 = vpop.f32.mrf.mxu2 }
  0xb2   : > { %v542_v60 = vpop.f32.mrf.mxu3  ;;  %v457_v61 = vpop.f32.mrf.mxu0 }
  0xb3   : > { %v543_v62 = vadd.f32 %v542_v60, %v513_v59  ;;  %v486_v63 = vpop.f32.mrf.mxu1 }
  0xb4   : > { %v487_v0 = vadd.f32 %v486_v63, %v457_v61 }
  0xb5   : > { %563 = vst [vmem:[#allocation2 + $0x20] sm:$0xff] %v543_v62 }
  0xb6   : > { %564 = vst [vmem:[#allocation2 + $0x30] sm:$0xff] %v487_v0 }
  0xb9   : > { %v515_v1 = vpop.f32.mrf.mxu2 }
  0xba   : > { %v544_v2 = vpop.f32.mrf.mxu3  ;;  %v460_v3 = vpop.f32.mrf.mxu0 }
  0xbb   : > { %v545_v4 = vadd.f32 %v544_v2, %v515_v1  ;;  %v489_v5 = vpop.f32.mrf.mxu1 }
  0xbc   : > { %v490_v6 = vadd.f32 %v489_v5, %v460_v3 }
  0xbd   : > { %565 = vst [vmem:[#allocation2 + $0x38] sm:$0xff] %v545_v4 }
  0xbe   : > { %566 = vst [vmem:[#allocation2 + $0x78] sm:$0xff] %v490_v6 }
  0xc1   : > { %v518_v7 = vpop.f32.mrf.mxu2 }
  0xc2   : > { %v547_v8 = vpop.f32.mrf.mxu3  ;;  %v462_v9 = vpop.f32.mrf.mxu0 }
  0xc3   : > { %v548_v10 = vadd.f32 %v547_v8, %v518_v7  ;;  %v491_v11 = vpop.f32.mrf.mxu1 }
  0xc4   : > { %v492_v12 = vadd.f32 %v491_v11, %v462_v9 }
  0xc5   : > { %567 = vst [vmem:[#allocation2 + $0x80] sm:$0xff] %v548_v10 }
  0xc6   : > { %568 = vst [vmem:[#allocation2 + $0x90] sm:$0xff] %v492_v12 }
  0xc9   : > { %v520_v13 = vpop.f32.mrf.mxu2 }
  0xca   : > { %v549_v14 = vpop.f32.mrf.mxu3  ;;  %v465_v15 = vpop.f32.mrf.mxu0 }
  0xcb   : > { %v550_v16 = vadd.f32 %v549_v14, %v520_v13  ;;  %v494_v17 = vpop.f32.mrf.mxu1 }
  0xcc   : > { %v495_v18 = vadd.f32 %v494_v17, %v465_v15 }
  0xcd   : > { %569 = vst [vmem:[#allocation2 + $0x98] sm:$0xff] %v550_v16 }
  0xce   : > { %570 = vst [vmem:[#allocation2 + $0xd8] sm:$0xff] %v495_v18 }
  0xd1   : > { %v523_v25 = vpop.f32.mrf.mxu2 }
  0xd2   : > { %v552_v27 = vpop.f32.mrf.mxu3  ;;  %v467_v28 = vpop.f32.mrf.mxu0 }
  0xd3   : > { %v553_v31 = vadd.f32 %v552_v27, %v523_v25  ;;  %v496_v32 = vpop.f32.mrf.mxu1 }
  0xd4   : > { %v497_v34 = vadd.f32 %v496_v32, %v467_v28 }
  0xd5   : > { %571 = vst [vmem:[#allocation2 + $0xe0] sm:$0xff] %v553_v31 }
  0xd6   : > { %572 = vst [vmem:[#allocation2 + $0xf0] sm:$0xff] %v497_v34 }
  0xd9   : > { %v525_v38 = vpop.f32.mrf.mxu2 }
  0xda   : > { %v554_v39 = vpop.f32.mrf.mxu3  ;;  %v470_v40 = vpop.f32.mrf.mxu0 }
  0xdb   : > { %v555_v41 = vadd.f32 %v554_v39, %v525_v38  ;;  %v499_v42 = vpop.f32.mrf.mxu1 }
  0xdc   : > { %v500_v43 = vadd.f32 %v499_v42, %v470_v40 }
  0xdd   : > { %573 = vst [vmem:[#allocation2 + $0xf8] sm:$0xff] %v555_v41 }
  0xde   : > { %574 = vst [vmem:[#allocation2 + $0x138] sm:$0xff] %v500_v43 }
  0xe1   : > { %v528_v44 = vpop.f32.mrf.mxu2 }
  0xe2   : > { %v557_v45 = vpop.f32.mrf.mxu3  ;;  %v472_v46 = vpop.f32.mrf.mxu0 }
  0xe3   : > { %v558_v47 = vadd.f32 %v557_v45, %v528_v44  ;;  %v501_v48 = vpop.f32.mrf.mxu1 }
  0xe4   : > { %v502_v49 = vadd.f32 %v501_v48, %v472_v46 }
  0xe5   : > { %575 = vst [vmem:[#allocation2 + $0x140] sm:$0xff] %v558_v47 }
  0xe6   : > { %576 = vst [vmem:[#allocation2 + $0x150] sm:$0xff] %v502_v49 }
  0xe9   : > { %v530_v50 = vpop.f32.mrf.mxu2 }
  0xea   : > { %v559_v51 = vpop.f32.mrf.mxu3 }
  0xeb   : > { %v560_v52 = vadd.f32 %v559_v51, %v530_v50 }
  0xed   : > { %577 = vst [vmem:[#allocation2 + $0x158] sm:$0xff] %v560_v52 }
  0xee LB: >> { %s1504_s30 = smul.u32 192, %s1540_s28  ;;  %vm678_vm1 = vcmask 1040384   ;;  %s1543_s6 = smov 16   ;;  %vm1015_vm3 = vcmask 1046528   ;;  %s1540_s28 = sphi %s1869_s28, %s637_s28  }
  0xef   : >> { %s1544_s29 = smov 112   ;;  %s1506_s8 = sshll.u32 %s1540_s28, 6 }
  0xf0   : >> { %s1875_s5 = scalar_lea.vmem [#allocation2], %s1504_s30  ;;  %s2373_s9 = scalar_lea.vmem %s1780_s7, %s1506_s8 }
  0xf1   : >> { %s637_s28 = sadd.s32 1, %s1540_s28  }
  0xf2   : >> { %p634_p4 = scmp.ge.s32.totalorder %s637_s28, 2  }
  0xf4   : >> { %v651_v53 = vld [vmem:[%s1875_s5 + $0x60] sm:$0x80]  ;;  %v1879_v54 = vld [vmem:[%s1875_s5 + $0x78] sm:$0xff]  ;;  %v657_v61 = vld [vmem:[%s1875_s5 + $0x90] sm:$0x7f] }
  0xf5   : >> { %v642_v55 = vld [vmem:[%s1875_s5] sm:$0x80]  ;;  %v694_v56 = vrot.slane %v651_v53, 7  ;;  %v695_v57 = vrot.slane %v1879_v54, 7  ;;  %v1884_v58 = vld [vmem:[%s1875_s5 + $0x18] sm:$0xff]  ;;  %v703_v6 = vrot.slane %v657_v61, 7 }
  0xf6   : >> { %v679_v59 = vrot.slane %v642_v55, 7  ;;  %v680_v60 = vrot.slane %v1884_v58, 7  ;;  %v643_v62 = vld [vmem:[%s1875_s5 + $0x8] sm:$0x80]  ;;  %v1890_v63 = vld [vmem:[%s1875_s5 + $0x20] sm:$0xff]  ;;  %v1982_v48 = vld [vmem:[%s1875_s5 + $0x30] sm:$0xff] }
  0xf7   : >> { %v1893_v0 = vsel %vm678_vm1, %v694_v56, %v695_v57  ;;  %v682_v1 = vrot.slane %v643_v62, 7  ;;  %v683_v2 = vrot.slane %v1890_v63, 7  ;;  %v648_v3 = vld [vmem:[%s1875_s5 + $0x30] sm:$0x7f]  ;;  %v649_v5 = vld [vmem:[%s1875_s5 + $0x38] sm:$0x7f]  ;;  %v1911_v10 = vsel %vm678_vm1, %v695_v57, %v703_v6 }
  0xf8   : >> { %725 = vrot.lane.b32.xlu1 %v1893_v0, %s1543_s6  ;;  %v1900_v4 = vsel %vm678_vm1, %v679_v59, %v680_v60  ;;  %v688_v8 = vrot.slane %v648_v3, 7  ;;  %v690_v9 = vrot.slane %v649_v5, 7  ;;  %v1917_v12 = vld [vmem:[%s1875_s5 + $0x80] sm:$0xff]  ;;  %v658_v13 = vld [vmem:[%s1875_s5 + $0x98] sm:$0x7f]  ;;  %v1928_v17 = vld [vmem:[%s1875_s5 + $0x28] sm:$0xff] }
  0xf9   : >> { %721 = vrot.lane.b32.xlu0 %v1900_v4, %s1543_s6  ;;  %v1906_v7 = vsel %vm678_vm1, %v682_v1, %v683_v2  ;;  %v652_v15 = vld [vmem:[%s1875_s5 + $0x68] sm:$0x80]  ;;  %v644_v16 = vld [vmem:[%s1875_s5 + $0x10] sm:$0x80]  ;;  %v698_v18 = vrot.slane %v1917_v12, 7  ;;  %v705_v22 = vrot.slane %v658_v13, 7 }
  0xfa   : >> { %729 = vrot.lane.b32.xlu2 %v1906_v7, %s1543_s6  ;;  %v1914_v11 = vsel %vm678_vm1, %v680_v60, %v688_v8  ;;  %v1921_v14 = vsel %vm678_vm1, %v683_v2, %v690_v9  ;;  %v697_v25 = vrot.slane %v652_v15, 7  ;;  %v685_v27 = vrot.slane %v644_v16, 7  ;;  %v653_v34 = vld [vmem:[%s1875_s5 + $0x70] sm:$0x80]  ;;  %v1944_v37 = vld [vmem:[%s1875_s5 + $0x88] sm:$0xff]  ;;  %v1994_v50 = vld [vmem:[%s1875_s5 + $0x38] sm:$0xff] }
  0xfb   : >> { %v686_v28 = vrot.slane %v1928_v17, 7  ;;  %v1937_v31 = vsel %vm678_vm1, %v698_v18, %v705_v22  ;;  %v650_v39 = vld [vmem:[%s1875_s5 + $0x40] sm:$0x7f]  ;;  %v700_v41 = vrot.slane %v653_v34, 7  ;;  %v701_v42 = vrot.slane %v1944_v37, 7  ;;  %v1991_v49 = vld [vmem:[%s1875_s5 + $0x90] sm:$0xff] }
  0xfc   : >> { %v1940_v32 = vsel %vm678_vm1, %v697_v25, %v698_v18  ;;  %v659_v40 = vld [vmem:[%s1875_s5 + $0xa0] sm:$0x7f]  ;;  %v692_v43 = vrot.slane %v650_v39, 7  ;;  %v2003_v51 = vld [vmem:[%s1875_s5 + $0x98] sm:$0xff]  ;;  %v2036_v59 = vand.u32 127, %v586_v29  ;;  %v2039_v60 = vperm.slane %v1811_v21, 0 }
  0xfd   : >> { %v687_v38 = vsel %vm678_vm1, %v685_v27, %v686_v28  ;;  %v707_v44 = vrot.slane %v659_v40, 7  ;;  %v702_v45 = vsel %vm678_vm1, %v700_v41, %v701_v42  ;;  %v2012_v52 = vld [vmem:[%s1875_s5 + $0x40] sm:$0xff]  ;;  %v779_v61 = vperm.slane %v1811_v21, 1  ;;  %v988_v18 = vld [vmem:[%s1875_s5 + $0x48] sm:$0x1] }
  0xfe   : >> { %v693_v46 = vsel %vm678_vm1, %v686_v28, %v692_v43  ;;  %v2015_v53 = vld [vmem:[%s1875_s5 + $0xa0] sm:$0xff]  ;;  %vm747_vm2 = vcmp.lt.s32.totalorder %v2036_v59, 16  ;;  %v2048_v62 = vperm.slane %v1801_v19, 0  ;;  %v758_v1 = vperm.slane %v1801_v19, 1  ;;  %v985_v25 = vld [vmem:[%s1875_s5 + $0x18] sm:$0xfe] }
  0xff   : >> { %v708_v47 = vsel %vm678_vm1, %v701_v42, %v707_v44  ;;  %v782_v3 = vmul.f32 %v2039_v60, %v1900_v4  ;;  %v783_v5 = vmul.f32 %v779_v61, %v1906_v7  ;;  %v1025_v27 = vrot.slane %v988_v18, 1 }
 0x100   : >> { %727 = vrot.lane.b32.xlu1 %v1911_v10, %s1543_s6  ;;  %v788_v28 = vmul.f32 %v2039_v60, %v1911_v10  ;;  %v1032_v42 = vrot.slane %v1991_v49, 1  ;;  %vm822_vm4 = vcmp.lt.s32.totalorder %v2036_v59, 112 }
 0x101   : >> { %723 = vrot.lane.b32.xlu0 %v1914_v11, %s1543_s6 }
 0x102   : >> { %731 = vrot.lane.b32.xlu2 %v1921_v14, %s1543_s6 }
 0x108   : >> { %735 = vrot.lane.b32.xlu1 %v1937_v31, %s1543_s6 }
 0x109   : >> { %733 = vrot.lane.b32.xlu0 %v1940_v32, %s1543_s6 }
 0x10a   : >> { %737 = vrot.lane.b32.xlu2 %v687_v38, %s1543_s6 }
 0x110   : >> { %741 = vrot.lane.b32.xlu1 %v702_v45, %s1543_s6 }
 0x111   : >> { %739 = vrot.lane.b32.xlu0 %v693_v46, %s1543_s6 }
 0x112   : >> { %743 = vrot.lane.b32.xlu2 %v708_v47, %s1543_s6 }
 0x118   : >> { %800 = vrot.lane.b32.xlu1 %v1914_v11, %s1544_s29 }
 0x119   : >> { %798 = vrot.lane.b32.xlu0 %v1900_v4, %s1544_s29  ;;  %v991_v4 = vld [vmem:[%s1875_s5 + $0x78] sm:$0xfe] }
 0x11a   : >> { %802 = vrot.lane.b32.xlu2 %v1893_v0, %s1544_s29  ;;  %v1031_v41 = vrot.slane %v991_v4, 1 }
 0x120   : >> { %806 = vrot.lane.b32.xlu1 %v1906_v7, %s1544_s29  ;;  %v1017_v7 = vrot.slane %v1982_v48, 1 }
 0x121   : >> { %804 = vrot.lane.b32.xlu0 %v1911_v10, %s1544_s29 }
 0x122   : >> { %808 = vrot.lane.b32.xlu2 %v1921_v14, %s1544_s29 }
 0x128   : >> { %812 = vrot.lane.b32.xlu1 %v1937_v31, %s1544_s29 }
 0x129   : >> { %810 = vrot.lane.b32.xlu0 %v1940_v32, %s1544_s29 }
 0x12a   : >> { %814 = vrot.lane.b32.xlu2 %v687_v38, %s1544_s29  ;;  %v1016_v38 = vrot.slane %v985_v25, 1 }
 0x130   : >> { %818 = vrot.lane.b32.xlu1 %v702_v45, %s1544_s29 }
 0x131   : >> { %816 = vrot.lane.b32.xlu0 %v693_v46, %s1544_s29  ;;  %v2089_v46 = vsel %vm1015_vm3, %v1017_v7, %v1025_v27 }
 0x132   : >> { %820 = vrot.lane.b32.xlu2 %v708_v47, %s1544_s29  ;;  %v2094_v47 = vsel %vm1015_vm3, %v1016_v38, %v1017_v7 }
 0x138   : >> { %860 = vrot.lane.b32.xlu1 %v1982_v48, %s1543_s6 }
 0x139   : >> { %858 = vrot.lane.b32.xlu0 %v1884_v58, %s1543_s6 }
 0x13a   : >> { %862 = vrot.lane.b32.xlu2 %v1879_v54, %s1543_s6 }
 0x140   : >> { %866 = vrot.lane.b32.xlu1 %v1890_v63, %s1543_s6 }
 0x141   : >> { %864 = vrot.lane.b32.xlu0 %v1991_v49, %s1543_s6 }
 0x142   : >> { %868 = vrot.lane.b32.xlu2 %v1994_v50, %s1543_s6 }
 0x148   : >> { %872 = vrot.lane.b32.xlu1 %v2003_v51, %s1543_s6 }
 0x149   : >> { %870 = vrot.lane.b32.xlu0 %v1917_v12, %s1543_s6 }
 0x14a   : >> { %874 = vrot.lane.b32.xlu2 %v1928_v17, %s1543_s6 }
 0x150   : >> { %878 = vrot.lane.b32.xlu1 %v1944_v37, %s1543_s6 }
 0x151   : >> { %876 = vrot.lane.b32.xlu0 %v2012_v52, %s1543_s6 }
 0x152   : >> { %880 = vrot.lane.b32.xlu2 %v2015_v53, %s1543_s6 }
 0x154   : >> { %v730_v55 = vpop.permute.xlu2 %729 }
 0x158   : >> { %934 = vrot.lane.b32.xlu1 %v1982_v48, %s1544_s29 }
 0x159   : >> { %932 = vrot.lane.b32.xlu0 %v1884_v58, %s1544_s29 }
 0x15a   : >> { %936 = vrot.lane.b32.xlu2 %v1879_v54, %s1544_s29 }
 0x15c   : >> { %v732_v56 = vpop.permute.xlu2 %731 }
 0x160   : >> { %940 = vrot.lane.b32.xlu1 %v1890_v63, %s1544_s29 }
 0x161   : >> { %938 = vrot.lane.b32.xlu0 %v1991_v49, %s1544_s29 }
 0x162   : >> { %942 = vrot.lane.b32.xlu2 %v1994_v50, %s1544_s29 }
 0x164   : >> { %v738_v57 = vpop.permute.xlu2 %737 }
 0x168   : >> { %946 = vrot.lane.b32.xlu1 %v2003_v51, %s1544_s29 }
 0x169   : >> { %944 = vrot.lane.b32.xlu0 %v1917_v12, %s1544_s29 }
 0x16a   : >> { %v2051_v2 = vpop.permute.xlu1 %725  ;;  %948 = vrot.lane.b32.xlu2 %v1928_v17, %s1544_s29 }
 0x16b   : >> { %v722_v6 = vpop.permute.xlu0 %721 }
 0x16c   : >> { %v748_v8 = vsel %vm747_vm2, %v722_v6, %v730_v55  ;;  %v752_v9 = vsel %vm747_vm2, %v738_v57, %v722_v6  ;;  %v744_v13 = vpop.permute.xlu2 %743  ;;  %v986_v55 = vld [vmem:[%s1875_s5 + $0x20] sm:$0xfe] }
 0x16d   : >> { %v761_v15 = vmul.f32 %v2048_v62, %v752_v9  ;;  %v762_v16 = vmul.f32 %v758_v1, %v748_v8  ;;  %v1019_v6 = vrot.slane %v986_v55, 1  ;;  %v1020_v8 = vrot.slane %v1994_v50, 1 }
 0x16e   : >> { %v789_v9 = vmul.f32 %v779_v61, %v1937_v31 }
 0x16f   : >> { %v2064_v22 = vadd.f32 %v782_v3, %v761_v15  ;;  %v2066_v17 = vadd.f32 %v783_v5, %v762_v16  ;;  %v2100_v3 = vsel %vm1015_vm3, %v1031_v41, %v1032_v42  ;;  %v994_v5 = vld [vmem:[%s1875_s5 + $0xa8] sm:$0x1]  ;;  %v787_v16 = vmul.f32 %v779_v61, %v1940_v32  ;;  %v992_v41 = vld [vmem:[%s1875_s5 + $0x80] sm:$0xfe] }
 0x170   : >> { %952 = vrot.lane.b32.xlu1 %v1944_v37, %s1544_s29  ;;  %v785_v37 = vmul.f32 %v779_v61, %v1921_v14  ;;  %v1040_v15 = vrot.slane %v994_v5, 1  ;;  %v2121_v38 = vsel %vm1015_vm3, %v1019_v6, %v1020_v8  ;;  %v995_v61 = vld [vmem:[%s1875_s5 + $0xb0] sm:$0x1]  ;;  %v1034_v55 = vrot.slane %v992_v41, 1 }
 0x171   : >> { %950 = vrot.lane.b32.xlu0 %v2012_v52, %s1544_s29  ;;  %v784_v5 = vmul.f32 %v2039_v60, %v1914_v11 }
 0x172   : >> { %v728_v34 = vpop.permute.xlu1 %727  ;;  %954 = vrot.lane.b32.xlu2 %v2015_v53, %s1544_s29  ;;  %v2126_v32 = vsel %vm1015_vm3, %v1032_v42, %v1040_v15  ;;  %v786_v42 = vmul.f32 %v2039_v60, %v1893_v0  ;;  %v993_v60 = vld [vmem:[%s1875_s5 + $0x88] sm:$0xfe] }
 0x173   : >> { %v755_v39 = vsel %vm747_vm2, %v744_v13, %v728_v34  ;;  %v724_v40 = vpop.permute.xlu0 %723 }
 0x174   : >> { %v767_v10 = vmul.f32 %v2048_v62, %v755_v39  ;;  %v749_v43 = vsel %vm747_vm2, %v724_v40, %v732_v56  ;;  %v2086_v44 = vpop.permute.xlu2 %802  ;;  %v989_v56 = vld [vmem:[%s1875_s5 + $0x50] sm:$0x1] }
 0x175   : >> { %v764_v45 = vmul.f32 %v758_v1, %v749_v43  ;;  %v1027_v4 = vrot.slane %v989_v56, 1  ;;  %v1042_v43 = vrot.slane %v995_v61, 1  ;;  %v1023_v56 = vrot.slane %v2012_v52, 1 }
 0x176   : >> { %v2091_v14 = vadd.f32 %v788_v28, %v767_v10  ;;  %v987_v10 = vld [vmem:[%s1875_s5 + $0x28] sm:$0xfe] }
 0x177   : >> { %v2097_v57 = vadd.f32 %v785_v37, %v764_v45  ;;  %v2132_v39 = vsel %vm1015_vm3, %v1020_v8, %v1027_v4  ;;  %v990_v4 = vld [vmem:[%s1875_s5 + $0x58] sm:$0x1] }
 0x178   : >> { %1060 = vrot.lane.b32.xlu1 %v2089_v46, %s1543_s6  ;;  %v1029_v61 = vrot.slane %v990_v4, 1 }
 0x179   : >> { %1058 = vrot.lane.b32.xlu0 %v2094_v47, %s1543_s6 }
 0x17a   : >> { %v736_v13 = vpop.permute.xlu1 %735  ;;  %1062 = vrot.lane.b32.xlu2 %v2100_v3, %s1543_s6 }
 0x17b   : >> { %v751_v18 = vsel %vm747_vm2, %v728_v34, %v736_v13  ;;  %v734_v25 = vpop.permute.xlu0 %733 }
 0x17c   : >> { %v768_v7 = vmul.f32 %v758_v1, %v751_v18  ;;  %v750_v27 = vsel %vm747_vm2, %v2051_v2, %v734_v25  ;;  %v2118_v31 = vpop.permute.xlu2 %808 }
 0x17d   : >> { %v766_v28 = vmul.f32 %v758_v1, %v750_v27  ;;  %v1035_v1 = vrot.slane %v2003_v51, 1  ;;  %v1037_v27 = vrot.slane %v993_v60, 1 }
 0x17e   : >> { %v2123_v37 = vadd.f32 %v789_v9, %v768_v7  ;;  %v1022_v9 = vrot.slane %v987_v10, 1  ;;  %v1038_v7 = vrot.slane %v2015_v53, 1 }
 0x17f   : >> { %v2129_v34 = vadd.f32 %v787_v16, %v766_v28  ;;  %v2156_v18 = vsel %vm1015_vm3, %v1035_v1, %v1042_v43  ;;  %v2159_v52 = vsel %vm1015_vm3, %v1034_v55, %v1035_v1  ;;  %v1030_v55 = vsel %vm1015_vm3, %v1023_v56, %v1029_v61 }
 0x180   : >> { %1066 = vrot.lane.b32.xlu1 %v2121_v38, %s1543_s6  ;;  %v2163_v25 = vsel %vm1015_vm3, %v1022_v9, %v1023_v56 }
 0x181   : >> { %1064 = vrot.lane.b32.xlu0 %v2126_v32, %s1543_s6 }
 0x182   : >> { %v742_v45 = vpop.permute.xlu1 %741  ;;  %1068 = vrot.lane.b32.xlu2 %v2132_v39, %s1543_s6 }
 0x183   : >> { %v754_v6 = vsel %vm747_vm2, %v742_v45, %v2051_v2  ;;  %v740_v8 = vpop.permute.xlu0 %739  ;;  %v1039_v45 = vsel %vm1015_vm3, %v1037_v27, %v1038_v7 }
 0x184   : >> { %v765_v0 = vmul.f32 %v2048_v62, %v754_v6  ;;  %v753_v13 = vsel %vm747_vm2, %v740_v8, %v724_v40  ;;  %v815_v15 = vpop.permute.xlu2 %814  ;;  %v996_v40 = vld [vmem:[%s1875_s5 + $0xb8] sm:$0x1]  ;;  %v833_v6 = vperm.slane %v1816_v23, 1 }
 0x185   : >> { %v763_v16 = vmul.f32 %v2048_v62, %v753_v13  ;;  %v832_v62 = vperm.slane %v1816_v23, 0  ;;  %v1044_v1 = vrot.slane %v996_v40, 1 }
 0x186   : >> { %v794_v11 = vadd.f32 %v786_v42, %v765_v0 }
 0x187   : >> { %v792_v2 = vadd.f32 %v784_v5, %v763_v16  ;;  %v1045_v5 = vsel %vm1015_vm3, %v1038_v7, %v1044_v1 }
 0x188   : >> { %1072 = vrot.lane.b32.xlu1 %v2156_v18, %s1543_s6 }
 0x189   : >> { %1070 = vrot.lane.b32.xlu0 %v2159_v52, %s1543_s6 }
 0x18a   : >> { %v801_v28 = vpop.permute.xlu1 %800  ;;  %1074 = vrot.lane.b32.xlu2 %v2163_v25, %s1543_s6 }
 0x18b   : >> { %v828_v41 = vsel %vm822_vm4, %v801_v28, %v2118_v31  ;;  %v799_v10 = vpop.permute.xlu0 %798 }
 0x18c   : >> { %v838_v43 = vmul.f32 %v832_v62, %v828_v41  ;;  %v821_v42 = vpop.permute.xlu2 %820 }
 0x18e   : >> { %v2180_v53 = vadd.f32 %v838_v43, %v792_v2 }
 0x190   : >> { %1078 = vrot.lane.b32.xlu1 %v1039_v45, %s1543_s6 }
 0x191   : >> { %1076 = vrot.lane.b32.xlu0 %v1030_v55, %s1543_s6 }
 0x192   : >> { %v807_v8 = vpop.permute.xlu1 %806  ;;  %1080 = vrot.lane.b32.xlu2 %v1045_v5, %s1543_s6 }
 0x193   : >> { %v823_v9 = vsel %vm822_vm4, %v807_v8, %v815_v15  ;;  %v827_v0 = vsel %vm822_vm4, %v799_v10, %v807_v8  ;;  %v805_v13 = vpop.permute.xlu0 %804 }
 0x194   : >> { %v836_v16 = vmul.f32 %v832_v62, %v827_v0  ;;  %v837_v56 = vmul.f32 %v833_v6, %v823_v9  ;;  %v2192_v60 = vpop.permute.xlu2 %862 }
 0x196   : >> { %v844_v2 = vadd.f32 %v836_v16, %v2064_v22  ;;  %v845_v4 = vadd.f32 %v837_v56, %v2066_v17  ;;  %v892_v16 = vperm.slane %v1821_v24, 1  ;;  %v891_v56 = vperm.slane %v1821_v24, 0 }
 0x198   : >> { %1134 = vrot.lane.b32.xlu1 %v2089_v46, %s1544_s29 }
 0x199   : >> { %1132 = vrot.lane.b32.xlu0 %v2094_v47, %s1544_s29 }
 0x19a   : >> { %v813_v40 = vpop.permute.xlu1 %812  ;;  %1136 = vrot.lane.b32.xlu2 %v2100_v3, %s1544_s29 }
 0x19b   : >> { %v826_v15 = vsel %vm822_vm4, %v813_v40, %v821_v42  ;;  %v830_v7 = vsel %vm822_vm4, %v805_v13, %v813_v40  ;;  %v811_v27 = vpop.permute.xlu0 %810  ;;  %v2225_v13 = vperm.slane %v1826_v26, 1 }
 0x19c   : >> { %v842_v22 = vmul.f32 %v832_v62, %v830_v7  ;;  %v843_v28 = vmul.f32 %v833_v6, %v826_v15  ;;  %v829_v17 = vsel %vm822_vm4, %v2086_v44, %v811_v27  ;;  %v869_v61 = vpop.permute.xlu2 %868 }
 0x19d   : >> { %v840_v41 = vmul.f32 %v832_v62, %v829_v17 }
 0x19e   : >> { %v850_v10 = vadd.f32 %v842_v22, %v2091_v14  ;;  %v851_v1 = vadd.f32 %v843_v28, %v2123_v37 }
 0x19f   : >> { %v848_v43 = vadd.f32 %v840_v41, %v794_v11 }
 0x1a0   : >> { %1140 = vrot.lane.b32.xlu1 %v2121_v38, %s1544_s29 }
 0x1a1   : >> { %1138 = vrot.lane.b32.xlu0 %v2126_v32, %s1544_s29 }
 0x1a2   : >> { %v819_v42 = vpop.permute.xlu1 %818  ;;  %1142 = vrot.lane.b32.xlu2 %v2132_v39, %s1544_s29 }
 0x1a3   : >> { %v825_v44 = vsel %vm822_vm4, %v811_v27, %v819_v42  ;;  %v817_v8 = vpop.permute.xlu0 %816 }
 0x1a4   : >> { %v841_v62 = vmul.f32 %v833_v6, %v825_v44  ;;  %v824_v14 = vsel %vm822_vm4, %v2118_v31, %v817_v8  ;;  %v875_v37 = vpop.permute.xlu2 %874 }
 0x1a5   : >> { %v839_v11 = vmul.f32 %v833_v6, %v824_v14  ;;  %v919_v6 = vmul.f32 %v2225_v13, %v1994_v50 }
 0x1a6   : >> { %v849_v9 = vadd.f32 %v841_v62, %v2129_v34 }
 0x1a7   : >> { %v847_v0 = vadd.f32 %v839_v11, %v2097_v57 }
 0x1a8   : >> { %1146 = vrot.lane.b32.xlu1 %v2156_v18, %s1544_s29 }
 0x1a9   : >> { %1144 = vrot.lane.b32.xlu0 %v2159_v52, %s1544_s29 }
 0x1aa   : >> { %v861_v31 = vpop.permute.xlu1 %860  ;;  %1148 = vrot.lane.b32.xlu2 %v2163_v25, %s1544_s29 }
 0x1ab   : >> { %v883_v57 = vsel %vm747_vm2, %v861_v31, %v869_v61  ;;  %v859_v34 = vpop.permute.xlu0 %858  ;;  %v2247_v61 = vperm.slane %v1826_v26, 0 }
 0x1ac   : >> { %v898_v40 = vmul.f32 %v892_v16, %v883_v57  ;;  %v886_v15 = vsel %vm747_vm2, %v875_v37, %v859_v34  ;;  %v881_v7 = vpop.permute.xlu2 %880 }
 0x1ad   : >> { %v895_v27 = vmul.f32 %v891_v56, %v886_v15 }
 0x1ae   : >> { %v906_v22 = vadd.f32 %v898_v40, %v847_v0 }
 0x1af   : >> { %v903_v28 = vadd.f32 %v895_v27, %v844_v2 }
 0x1b0   : >> { %1152 = vrot.lane.b32.xlu1 %v1039_v45, %s1544_s29  ;;  %v2242_v17 = vadd.f32 %v919_v6, %v906_v22  ;;  %v922_v45 = vmul.f32 %v2247_v61, %v1991_v49 }
 0x1b1   : >> { %1150 = vrot.lane.b32.xlu0 %v1030_v55, %s1544_s29 }
 0x1b2   : >> { %v867_v25 = vpop.permute.xlu1 %866  ;;  %1154 = vrot.lane.b32.xlu2 %v1045_v5, %s1544_s29 }
 0x1b3   : >> { %v882_v50 = vsel %vm747_vm2, %v859_v34, %v867_v25  ;;  %v865_v41 = vpop.permute.xlu0 %864 }
 0x1b4   : >> { %v896_v42 = vmul.f32 %v892_v16, %v882_v50  ;;  %v889_v2 = vsel %vm747_vm2, %v881_v7, %v865_v41  ;;  %v937_v44 = vpop.permute.xlu2 %936 }
 0x1b5   : >> { %v901_v8 = vmul.f32 %v891_v56, %v889_v2 }
 0x1b6   : >> { %v2255_v55 = vadd.f32 %v896_v42, %v845_v4  ;;  %v916_v42 = vmul.f32 %v2247_v61, %v1884_v58 }
 0x1b7   : >> { %v909_v62 = vadd.f32 %v901_v8, %v850_v10 }
 0x1b9   : >> { %v930_v5 = vadd.f32 %v922_v45, %v909_v62  ;;  %v920_v62 = vmul.f32 %v2247_v61, %v1879_v54  ;;  %v921_v54 = vmul.f32 %v2225_v13, %v1917_v12  ;;  %v1113_v12 = vperm.slane %v1841_v35, 1 }
 0x1ba   : >> { %v873_v14 = vpop.permute.xlu1 %872 }
 0x1bb   : >> { %v885_v37 = vsel %vm747_vm2, %v865_v41, %v873_v14  ;;  %v871_v11 = vpop.permute.xlu0 %870 }
 0x1bc   : >> { %v902_v0 = vmul.f32 %v892_v16, %v885_v37  ;;  %v884_v57 = vsel %vm747_vm2, %v2192_v60, %v871_v11  ;;  %v2262_v34 = vpop.permute.xlu2 %942 }
 0x1bd   : >> { %v900_v6 = vmul.f32 %v892_v16, %v884_v57 }
 0x1be   : >> { %v2264_v40 = vadd.f32 %v902_v0, %v851_v1 }
 0x1bf   : >> { %v908_v49 = vadd.f32 %v900_v6, %v849_v9 }
 0x1c2   : >> { %v879_v4 = vpop.permute.xlu1 %878 }
 0x1c3   : >> { %v888_v10 = vsel %vm747_vm2, %v879_v4, %v2192_v60  ;;  %v877_v15 = vpop.permute.xlu0 %876  ;;  %v2281_v60 = vperm.slane %v1831_v30, 0 }
 0x1c4   : >> { %v899_v7 = vmul.f32 %v891_v56, %v888_v10  ;;  %v887_v27 = vsel %vm747_vm2, %v877_v15, %v861_v31  ;;  %v949_v22 = vpop.permute.xlu2 %948  ;;  %v966_v15 = vperm.slane %v1831_v30, 1 }
 0x1c5   : >> { %v897_v25 = vmul.f32 %v891_v56, %v887_v27 }
 0x1c6   : >> { %v907_v50 = vadd.f32 %v899_v7, %v848_v43  ;;  %v924_v43 = vadd.f32 %v916_v42, %v903_v28 }
 0x1c7   : >> { %v2272_v41 = vadd.f32 %v897_v25, %v2180_v53 }
 0x1c8   : >> { %v928_v57 = vadd.f32 %v920_v62, %v907_v50  ;;  %v1091_v62 = vperm.slane %v1836_v33, 0 }
 0x1ca   : >> { %v2274_v16 = vpop.permute.xlu1 %934 }
 0x1cb   : >> { %v933_v1 = vpop.permute.xlu0 %932 }
 0x1cc   : >> { %v2276_v9 = vpop.permute.xlu2 %954 }
 0x1d2   : >> { %v941_v2 = vpop.permute.xlu1 %940 }
 0x1d3   : >> { %v960_v31 = vsel %vm822_vm4, %v933_v1, %v941_v2  ;;  %v939_v56 = vpop.permute.xlu0 %938  ;;  %v929_v1 = vadd.f32 %v921_v54, %v908_v49 }
 0x1d4   : >> { %v969_v53 = vmul.f32 %v2281_v60, %v960_v31  ;;  %v2286_v45 = vpop.permute.xlu2 %1062 }
 0x1d6   : >> { %v977_v8 = vadd.f32 %v969_v53, %v924_v43  ;;  %v1092_v43 = vperm.slane %v1836_v33, 1  ;;  %v1112_v53 = vperm.slane %v1841_v35, 0 }
 0x1da   : >> { %v947_v14 = vpop.permute.xlu1 %946 }
 0x1db   : >> { %v963_v58 = vsel %vm822_vm4, %v939_v56, %v947_v14  ;;  %v945_v37 = vpop.permute.xlu0 %944 }
 0x1dc   : >> { %v975_v11 = vmul.f32 %v2281_v60, %v963_v58  ;;  %v962_v0 = vsel %vm822_vm4, %v937_v44, %v945_v37  ;;  %v1069_v6 = vpop.permute.xlu2 %1068 }
 0x1dd   : >> { %v973_v28 = vmul.f32 %v2281_v60, %v962_v0 }
 0x1de   : >> { %v983_v4 = vadd.f32 %v975_v11, %v930_v5  ;;  %v1119_v11 = vmul.f32 %v1113_v12, %v2132_v39 }
 0x1df   : >> { %v2296_v10 = vadd.f32 %v973_v28, %v928_v57  ;;  %v1116_v57 = vmul.f32 %v1112_v53, %v2094_v47  ;;  %v956_v28 = vsel %vm822_vm4, %v941_v2, %v949_v22  ;;  %v1117_v22 = vmul.f32 %v1113_v12, %v2121_v38 }
 0x1e2   : >> { %v953_v7 = vpop.permute.xlu1 %952 }
 0x1e3   : >> { %v958_v27 = vsel %vm822_vm4, %v945_v37, %v953_v7  ;;  %v951_v25 = vpop.permute.xlu0 %950  ;;  %v917_v7 = vmul.f32 %v2225_v13, %v1890_v63 }
 0x1e4   : >> { %v974_v42 = vmul.f32 %v966_v15, %v958_v27  ;;  %v957_v44 = vsel %vm822_vm4, %v2262_v34, %v951_v25  ;;  %v1075_v56 = vpop.permute.xlu2 %1074 }
 0x1e5   : >> { %v972_v50 = vmul.f32 %v966_v15, %v957_v44  ;;  %v925_v44 = vadd.f32 %v917_v7, %v2255_v55  ;;  %v923_v55 = vmul.f32 %v2225_v13, %v2003_v51  ;;  %v1121_v13 = vmul.f32 %v1113_v12, %v2159_v52 }
 0x1e6   : >> { %v982_v5 = vadd.f32 %v974_v42, %v929_v1  ;;  %v970_v1 = vmul.f32 %v966_v15, %v956_v28 }
 0x1e7   : >> { %v980_v31 = vadd.f32 %v972_v50, %v2242_v17  ;;  %v931_v28 = vadd.f32 %v923_v55, %v2264_v40  ;;  %v961_v40 = vsel %vm822_vm4, %v2274_v16, %v2262_v34  ;;  %v1120_v34 = vmul.f32 %v1112_v53, %v2100_v3 }
 0x1e8   : >> { %v978_v2 = vadd.f32 %v970_v1, %v925_v44  ;;  %v918_v1 = vmul.f32 %v2247_v61, %v1982_v48  ;;  %v971_v44 = vmul.f32 %v2281_v60, %v961_v40  ;;  %v1118_v60 = vmul.f32 %v1112_v53, %v2089_v46 }
 0x1ea   : >> { %v1061_v58 = vpop.permute.xlu1 %1060 }
 0x1eb   : >> { %v1083_v49 = vsel %vm747_vm2, %v1061_v58, %v1069_v6  ;;  %v1059_v37 = vpop.permute.xlu0 %1058 }
 0x1ec   : >> { %v1098_v0 = vmul.f32 %v1092_v43, %v1083_v49  ;;  %v1086_v17 = vsel %vm747_vm2, %v1075_v56, %v1059_v37  ;;  %v1081_v42 = vpop.permute.xlu2 %1080 }
 0x1ed   : >> { %v1095_v54 = vmul.f32 %v1091_v62, %v1086_v17 }
 0x1ee   : >> { %v1106_v27 = vadd.f32 %v1098_v0, %v980_v31  ;;  %v959_v31 = vsel %vm822_vm4, %v947_v14, %v2276_v9  ;;  %v1123_v9 = vmul.f32 %v1113_v12, %v2156_v18 }
 0x1ef   : >> { %v1103_v25 = vadd.f32 %v1095_v54, %v977_v8  ;;  %v1122_v8 = vmul.f32 %v1112_v53, %v2126_v32  ;;  %v976_v17 = vmul.f32 %v966_v15, %v959_v31 }
 0x1f0   : >> { %v2321_v6 = vadd.f32 %v1119_v11, %v1106_v27 }
 0x1f1   : >> { %v2323_v39 = vadd.f32 %v1116_v57, %v1103_v25  ;;  %v984_v14 = vadd.f32 %v976_v17, %v931_v28  ;;  %v1187_v28 = vperm.slane %v1806_v20, 1 }
 0x1f2   : >> { %v1067_v50 = vpop.permute.xlu1 %1066 }
 0x1f3   : >> { %v1082_v47 = vsel %vm747_vm2, %v1059_v37, %v1067_v50  ;;  %v1065_v56 = vpop.permute.xlu0 %1064 }
 0x1f4   : >> { %v1096_v49 = vmul.f32 %v1092_v43, %v1082_v47  ;;  %v1089_v63 = vsel %vm747_vm2, %v1081_v42, %v1065_v56  ;;  %v2340_v7 = vpop.permute.xlu2 %1136 }
 0x1f5   : >> { %v1101_v11 = vmul.f32 %v1091_v62, %v1089_v63 }
 0x1f6   : >> { %v1104_v0 = vadd.f32 %v1096_v49, %v978_v2  ;;  %v1165_v2 = vperm.slane %v1846_v36, 0 }
 0x1f7   : >> { %v1109_v37 = vadd.f32 %v1101_v11, %v983_v4 }
 0x1f8   : >> { %v1125_v57 = vadd.f32 %v1117_v22, %v1104_v0 }
 0x1f9   : >> { %v2337_v38 = vadd.f32 %v1122_v8, %v1109_v37 }
 0x1fa   : >> { %v1073_v54 = vpop.permute.xlu1 %1072 }
 0x1fb   : >> { %v1085_v32 = vsel %vm747_vm2, %v1065_v56, %v1073_v54  ;;  %v1071_v27 = vpop.permute.xlu0 %1070  ;;  %v926_v56 = vadd.f32 %v918_v1, %v2272_v41 }
 0x1fc   : >> { %v1102_v25 = vmul.f32 %v1092_v43, %v1085_v32  ;;  %v1084_v51 = vsel %vm747_vm2, %v2286_v45, %v1071_v27  ;;  %v1143_v61 = vpop.permute.xlu2 %1142 }
 0x1fd   : >> { %v1100_v4 = vmul.f32 %v1092_v43, %v1084_v51 }
 0x1fe   : >> { %v1110_v15 = vadd.f32 %v1102_v25, %v984_v14 }
 0x1ff   : >> { %v1108_v42 = vadd.f32 %v1100_v4, %v982_v5  ;;  %v979_v5 = vadd.f32 %v971_v44, %v926_v56 }
 0x200   : >> { %v1131_v18 = vadd.f32 %v1123_v9, %v1110_v15 }
 0x201   : >> { %v2356_v50 = vadd.f32 %v1121_v13, %v1108_v42 }
 0x202   : >> { %v1079_v47 = vpop.permute.xlu1 %1078 }
 0x203   : >> { %v1088_v52 = vsel %vm747_vm2, %v1079_v47, %v2286_v45  ;;  %v1077_v12 = vpop.permute.xlu0 %1076 }
 0x204   : >> { %v1099_v16 = vmul.f32 %v1091_v62, %v1088_v52  ;;  %v1087_v48 = vsel %vm747_vm2, %v1077_v12, %v1061_v58  ;;  %v1186_v58 = vperm.slane %v1806_v20, 0  ;;  %v1149_v53 = vpop.permute.xlu2 %1148 }
 0x205   : >> { %v1097_v43 = vmul.f32 %v1091_v62, %v1087_v48  ;;  %v1166_v62 = vperm.slane %v1846_v36, 1 }
 0x206   : >> { %v1107_v41 = vadd.f32 %v1099_v16, %v2296_v10 }
 0x207   : >> { %v1105_v22 = vadd.f32 %v1097_v43, %v979_v5 }
 0x208   : >> { %v1128_v45 = vadd.f32 %v1120_v34, %v1107_v41 }
 0x209   : >> { %v1126_v49 = vadd.f32 %v1118_v60, %v1105_v22 }
 0x20a   : >> { %v1135_v63 = vpop.permute.xlu1 %1134 }
 0x20b   : >> { %v1161_v3 = vsel %vm822_vm4, %v1135_v63, %v1143_v61  ;;  %v1133_v8 = vpop.permute.xlu0 %1132 }
 0x20c   : >> { %v1171_v31 = vmul.f32 %v1165_v2, %v1161_v3  ;;  %v1155_v25 = vpop.permute.xlu2 %1154 }
 0x20e   : >> { %v1179_v46 = vadd.f32 %v1171_v31, %v1126_v49 }
 0x210   : >> { %v1192_v10 = vadd.f32 %v1186_v58, %v1179_v46 }
 0x212   : >> { %1203 = vst [vmem:[%s2373_s9 + $0x10] sm:$0xff] %v1192_v10  ;;  %v1141_v11 = vpop.permute.xlu1 %1140 }
 0x213   : >> { %v1160_v55 = vsel %vm822_vm4, %v1133_v8, %v1141_v11  ;;  %v1156_v0 = vsel %vm822_vm4, %v1141_v11, %v1149_v53  ;;  %v1139_v37 = vpop.permute.xlu0 %1138 }
 0x214   : >> { %v1169_v17 = vmul.f32 %v1165_v2, %v1160_v55  ;;  %v1170_v54 = vmul.f32 %v1166_v62, %v1156_v0 }
 0x216   : >> { %v1177_v32 = vadd.f32 %v1169_v17, %v2323_v39  ;;  %v1178_v27 = vadd.f32 %v1170_v54, %v1125_v57 }
 0x218   : >> { %v1190_v9 = vadd.f32 %v1186_v58, %v1177_v32  ;;  %v1191_v14 = vadd.f32 %v1187_v28, %v1178_v27 }
 0x21a   : >> { %1201 = vst [vmem:[%s2373_s9] sm:$0xff] %v1190_v9  ;;  %v1147_v51 = vpop.permute.xlu1 %1146 }
 0x21b   : >> { %1202 = vst [vmem:[%s2373_s9 + $0x8] sm:$0xff] %v1191_v14  ;;  %v1163_v13 = vsel %vm822_vm4, %v1139_v37, %v1147_v51  ;;  %v1159_v4 = vsel %vm822_vm4, %v1147_v51, %v1155_v25  ;;  %v1145_v40 = vpop.permute.xlu0 %1144 }
 0x21c   : >> { %v1175_v15 = vmul.f32 %v1165_v2, %v1163_v13  ;;  %v1176_v1 = vmul.f32 %v1166_v62, %v1159_v4  ;;  %v1162_v39 = vsel %vm822_vm4, %v2340_v7, %v1145_v40 }
 0x21d   : >> { %v1173_v57 = vmul.f32 %v1165_v2, %v1162_v39 }
 0x21e   : >> { %v1183_v42 = vadd.f32 %v1175_v15, %v2337_v38  ;;  %v1184_v44 = vadd.f32 %v1176_v1, %v1131_v18 }
 0x21f   : >> { %v1181_v47 = vadd.f32 %v1173_v57, %v1128_v45 }
 0x220   : >> { %v1196_v56 = vadd.f32 %v1186_v58, %v1183_v42  ;;  %v1197_v52 = vadd.f32 %v1187_v28, %v1184_v44 }
 0x221   : >> { %v1194_v12 = vadd.f32 %v1186_v58, %v1181_v47 }
 0x222   : >> { %1207 = vst [vmem:[%s2373_s9 + $0x30] sm:$0xff] %v1196_v56  ;;  %v1153_v34 = vpop.permute.xlu1 %1152 }
 0x223   : >> { %1208 = vst [vmem:[%s2373_s9 + $0x38] sm:$0xff] %v1197_v52  ;;  %v1158_v16 = vsel %vm822_vm4, %v1145_v40, %v1153_v34  ;;  %v1151_v48 = vpop.permute.xlu0 %1150 }
 0x224   : >> { %1205 = vst [vmem:[%s2373_s9 + $0x20] sm:$0xff] %v1194_v12  ;;  %v1174_v60 = vmul.f32 %v1166_v62, %v1158_v16  ;;  %v1157_v7 = vsel %vm822_vm4, %v1143_v61, %v1151_v48 }
 0x225   : >> { %v1172_v38 = vmul.f32 %v1166_v62, %v1157_v7 }
 0x226   : >> { %v1182_v18 = vadd.f32 %v1174_v60, %v2356_v50 }
 0x227   : >> { %v1180_v5 = vadd.f32 %v1172_v38, %v2321_v6  ;;  %636 = sbr.rel (!%p634_p4) target bundleno = 238 (0xee), region = 91 }
 0x228   : >> { %v1195_v43 = vadd.f32 %v1187_v28, %v1182_v18 }
 0x229   : >> { %v1193_v41 = vadd.f32 %v1187_v28, %v1180_v5 }
 0x22a   : >> { %1206 = vst [vmem:[%s2373_s9 + $0x28] sm:$0xff] %v1195_v43 }
 0x22b   : >> { %1204 = vst [vmem:[%s2373_s9 + $0x18] sm:$0xff] %v1193_v41 }
 0x22c PF: > { %s14_s15 = sadd.s32 1, %s1536_s15  }
 0x22d   : > { %p11_p5 = scmp.ge.s32.totalorder %s14_s15, 4  }
 0x22f   :  { %13 = sbr.rel (!%p11_p5) target bundleno = 1 (0x1), region = 102 }

</bundles_post_ra>
